<compile_context>
chip_gen: v7x
topology: tpu7x:2x2x1
jax: 0.10.0
libtpu: 0.0.40
codegen_flags: <defaults>
</compile_context>

<pallas_src>
import functools

import jax
import jax.numpy as jnp
from jax.experimental import pallas as pl
from jax.experimental.pallas import tpu as pltpu

EPS = 1e-5


# ----------------------------------------------------------------------------
# Kernel
# ----------------------------------------------------------------------------
def _conv3x3_in_relu(buf_ref, im_ref, cin, mask_l, mask_r,
                     w_ref, g_ref, b_ref, *, W, S, PAD):
    """3x3 conv (pad=1, no bias) + InstanceNorm2d(affine) + ReLU, all in VMEM.

    buf_ref : (Cmax, PAD+S+PAD) f32.  Rows [0, cin) hold the input with
              flattened spatial index (y*W + x) at lane offset PAD; lanes
              [0, PAD) and [PAD+S, end) are zero, so vertically out-of-range
              taps read zeros.
    im_ref  : (9*Cmax, S) bf16 stack scratch: the 9 shifted/masked copies are
              stacked tap-major so the whole conv is ONE MXU matmul with
              contraction K = 9*cin.
    w_ref   : (Cout, 9*cin) bf16; column t*cin + c multiplies input channel c
              at tap t = (dy+1)*3 + (dx+1).
    mask_l / mask_r : (1, S) f32 validity masks for dx = -1 / dx = +1 taps.
              dx == 0 taps need no mask (vertical overflow hits pad zeros).
    g_ref/b_ref : (Cout, 1) f32 InstanceNorm affine params.
    Returns (Cout, S) f32.
    """
    t = 0
    for dy in (-1, 0, 1):
        for dx in (-1, 0, 1):
            start = PAD + dy * W + dx                      # static python int
            shifted = buf_ref[0:cin, start:start + S]      # (cin, S) f32
            if dx == -1:
                shifted = shifted * mask_l
            elif dx == 1:
                shifted = shifted * mask_r
            im_ref[t * cin:(t + 1) * cin, :] = shifted.astype(im_ref.dtype)
            t += 1

    # Single fused MXU matmul: (Cout, 9*cin) @ (9*cin, S) -> f32 accumulate.
    acc = jnp.dot(w_ref[...], im_ref[0:9 * cin, :],
                  preferred_element_type=jnp.float32)      # (Cout, S)

    # InstanceNorm2d: per-channel stats over the full spatial extent,
    # centered two-pass variance in f32, eps=1e-5, affine.
    mean = jnp.mean(acc, axis=1, keepdims=True)            # (Cout, 1)
    xc = acc - mean
    var = jnp.mean(xc * xc, axis=1, keepdims=True)
    y = xc * jax.lax.rsqrt(var + EPS)
    y = y * g_ref[...] + b_ref[...]
    return jnp.maximum(y, 0.0)


def up_kernel(x1_ref, x2_ref, mt_ref,
              w1_ref, g1_ref, b1_ref, w2_ref, g2_ref, b2_ref,
              o_ref, buf_ref, im_ref, *, W, S, C1, C2, Cmid, PAD):
    # Zero ONLY the pad-lane columns.  The data region [PAD, PAD+S) is fully
    # overwritten by the x2/x1u/h stores every iteration.  Done per step (not
    # pl.when(program_id == 0)) so it remains correct when the "parallel"
    # batch axis is split across TensorCores (each core has its own scratch).
    zpad = jnp.zeros((buf_ref.shape[0], PAD), buf_ref.dtype)
    buf_ref[:, 0:PAD] = zpad
    buf_ref[:, PAD + S:PAD + S + PAD] = zpad

    # Horizontal-wrap masks for the dx = +-1 taps, built in-kernel (no DMA).
    xcol = jax.lax.broadcasted_iota(jnp.int32, (1, S), 1) % W
    mask_l = (xcol != 0).astype(jnp.float32)       # dx = -1 invalid at x == 0
    mask_r = (xcol != W - 1).astype(jnp.float32)   # dx = +1 invalid at x == W-1

    # Bilinear upsample (+ diffY/diffX pad) of all C1 channels as ONE bf16
    # MXU matmul on the flattened spatial axis, then channel-concat with x2
    # by stacking into the scratch rows (x2 first, upsampled x1 second, as in
    # torch.cat([x2, x1])).
    x1u = jnp.dot(x1_ref[...], mt_ref[...],
                  preferred_element_type=jnp.float32)                # (C1, S)
    buf_ref[0:C2, PAD:PAD + S] = x2_ref[...].astype(jnp.float32)
    buf_ref[C2:C2 + C1, PAD:PAD + S] = x1u

    # conv1 + IN + ReLU : mid activation never leaves VMEM.
    h = _conv3x3_in_relu(buf_ref, im_ref, C1 + C2, mask_l, mask_r,
                         w1_ref, g1_ref, b1_ref, W=W, S=S, PAD=PAD)  # (Cmid,S)

    # Reuse the same scratch for conv2 (rows [0, Cmid)); pad lanes stay zero,
    # rows >= Cmid are never read by conv2.
    buf_ref[0:Cmid, PAD:PAD + S] = h
    y = _conv3x3_in_relu(buf_ref, im_ref, Cmid, mask_l, mask_r,
                         w2_ref, g2_ref, b2_ref, W=W, S=S, PAD=PAD)  # (Cout,S)

    o_ref[...] = y.astype(o_ref.dtype)


# ----------------------------------------------------------------------------
# Host-side constant prep + wrapper
# ----------------------------------------------------------------------------
def bilinear_matrix(n_in, n_out):
    """(n_out, n_in) M with out = M @ in; bilinear, align_corners=True."""
    if n_in == 1:
        return jnp.ones((n_out, 1), jnp.float32)
    src = jnp.arange(n_out, dtype=jnp.float32) * (n_in - 1) / (n_out - 1)
    lo = jnp.clip(jnp.floor(src).astype(jnp.int32), 0, n_in - 2)
    frac = src - lo.astype(jnp.float32)
    rows = jnp.arange(n_out)
    m = jnp.zeros((n_out, n_in), jnp.float32)
    m = m.at[rows, lo].add(1.0 - frac)
    m = m.at[rows, lo + 1].add(frac)
    return m


def up_forward_pallas(x1, x2, params):
    """Up.forward(x1, x2) -> NCHW output, one fused Pallas kernel per batch."""
    N, C1, Hi, Wi = x1.shape
    N2, C2, H, W = x2.shape
    assert N == N2
    S = H * W
    Cin = C1 + C2
    Cmid = params["w1"].shape[0]
    Cout = params["w2"].shape[0]

    # Upsample (align_corners=True) + diffY/diffX zero pad folded into one
    # (Hi*Wi, H*W) matrix: out_flat = in_flat @ mt.  (Fine at these toy sizes;
    # see TODO at top for separable upsampling at real UNet shapes.)
    diffY, diffX = H - 2 * Hi, W - 2 * Wi
    mh = jnp.pad(bilinear_matrix(Hi, 2 * Hi),
                 ((diffY // 2, diffY - diffY // 2), (0, 0)))          # (H, Hi)
    mw = jnp.pad(bilinear_matrix(Wi, 2 * Wi),
                 ((diffX // 2, diffX - diffX // 2), (0, 0)))          # (W, Wi)
    mt = jnp.kron(mh, mw).T.astype(jnp.bfloat16)                      # (HiWi,S)

    # Conv weights collapsed to 2-D (Cout, 9*Cin), tap-major columns
    # (column index = (ky*3 + kx)*Cin + c), so each conv is ONE matmul.
    w1t = jnp.transpose(params["w1"], (0, 2, 3, 1)).reshape(Cmid, 9 * Cin)
    w2t = jnp.transpose(params["w2"], (0, 2, 3, 1)).reshape(Cout, 9 * Cmid)
    w1t = w1t.astype(jnp.bfloat16)
    w2t = w2t.astype(jnp.bfloat16)
    g1 = params["g1"].reshape(Cmid, 1).astype(jnp.float32)
    b1 = params["b1"].reshape(Cmid, 1).astype(jnp.float32)
    g2 = params["g2"].reshape(Cout, 1).astype(jnp.float32)
    b2 = params["b2"].reshape(Cout, 1).astype(jnp.float32)

    # bf16 MXU operands at the HBM boundary (halves input DMA traffic); all
    # accumulation / InstanceNorm math stays f32 inside the kernel.
    x1f = x1.reshape(N, C1, Hi * Wi).astype(jnp.bfloat16)
    x2f = x2.reshape(N, C2, S).astype(jnp.bfloat16)

    PAD = 128                           # lane-aligned data offset in scratch
    buf_rows = max(Cin, Cmid)
    buf_w = PAD + S + PAD
    im_rows = 9 * max(Cin, Cmid)

    kernel = functools.partial(up_kernel, W=W, S=S, C1=C1, C2=C2,
                               Cmid=Cmid, PAD=PAD)

    out = pl.pallas_call(
        kernel,
        out_shape=jax.ShapeDtypeStruct((N, Cout, S), x2.dtype),
        grid=(N,),
        in_specs=[
            pl.BlockSpec((None, C1, Hi * Wi), lambda n: (n, 0, 0)),
            pl.BlockSpec((None, C2, S), lambda n: (n, 0, 0)),
            pl.BlockSpec((Hi * Wi, S), lambda n: (0, 0)),
            pl.BlockSpec((Cmid, 9 * Cin), lambda n: (0, 0)),
            pl.BlockSpec((Cmid, 1), lambda n: (0, 0)),
            pl.BlockSpec((Cmid, 1), lambda n: (0, 0)),
            pl.BlockSpec((Cout, 9 * Cmid), lambda n: (0, 0)),
            pl.BlockSpec((Cout, 1), lambda n: (0, 0)),
            pl.BlockSpec((Cout, 1), lambda n: (0, 0)),
        ],
        out_specs=pl.BlockSpec((None, Cout, S), lambda n: (n, 0, 0)),
        scratch_shapes=[pltpu.VMEM((buf_rows, buf_w), jnp.float32),
                        pltpu.VMEM((im_rows, S), jnp.bfloat16)],
        compiler_params=pltpu.CompilerParams(
            dimension_semantics=("parallel",)),
    )(x1f, x2f, mt, w1t, g1, b1, w2t, g2, b2)

    # (N, Cout, H*W) is already NCHW-flat: contiguous reshape, no transpose.
    return out.reshape(N, Cout, H, W)


# ----------------------------------------------------------------------------
# Pure-JAX reference (ground truth, full f32 precision)
# ----------------------------------------------------------------------------
def up_forward_ref(x1, x2, params):
    N, C1, Hi, Wi = x1.shape
    ah = bilinear_matrix(Hi, 2 * Hi)
    aw = bilinear_matrix(Wi, 2 * Wi)
    x1u = jnp.einsum("oh,nchw,pw->ncop", ah, x1, aw,
                     precision=jax.lax.Precision.HIGHEST)
    diffY = x2.shape[2] - x1u.shape[2]
    diffX = x2.shape[3] - x1u.shape[3]
    x1u = jnp.pad(
        x1u,
        ((0, 0), (0, 0),
         (diffY // 2, diffY - diffY // 2),
         (diffX // 2, diffX - diffX // 2)),
    )
    x = jnp.concatenate([x2, x1u], axis=1)

    def block(x, w, g, b):
        y = jax.lax.conv_general_dilated(
            x, w, (1, 1), ((1, 1), (1, 1)),
            dimension_numbers=("NCHW", "OIHW", "NCHW"),
            precision=jax.lax.Precision.HIGHEST)
        mean = y.mean((2, 3), keepdims=True)
        var = ((y - mean) ** 2).mean((2, 3), keepdims=True)
        y = (y - mean) * jax.lax.rsqrt(var + EPS)
        y = y * g[None, :, None, None] + b[None, :, None, None]
        return jnp.maximum(y, 0.0)

    y = block(x, params["w1"], params["g1"], params["b1"])
    y = block(y, params["w2"], params["g2"], params["b2"])
    return y


# ----------------------------------------------------------------------------
if __name__ == "__main__":
    # Up(in_channels=8, out_channels=4, bilinear=True)
    # => DoubleConv(8, 4, mid_channels=4)
    in_channels, out_channels = 8, 4
    mid_channels = in_channels // 2

    key = jax.random.PRNGKey(0)
    k1, k2, k3, k4, k5, k6, kx1, kx2 = jax.random.split(key, 8)

    params = {
        # conv1: (mid, in, 3, 3); conv2: (out, mid, 3, 3)  -- bias=False
        "w1": 0.1 * jax.random.normal(k1, (mid_channels, in_channels, 3, 3), jnp.float32),
        "g1": 1.0 + 0.1 * jax.random.normal(k2, (mid_channels,), jnp.float32),
        "b1": 0.1 * jax.random.normal(k3, (mid_channels,), jnp.float32),
        "w2": 0.1 * jax.random.normal(k4, (out_channels, mid_channels, 3, 3), jnp.float32),
        "g2": 1.0 + 0.1 * jax.random.normal(k5, (out_channels,), jnp.float32),
        "b2": 0.1 * jax.random.normal(k6, (out_channels,), jnp.float32),
    }

    # x1: coarse feature map (to be upsampled), x2: skip connection.
    # cat channels = 4 + 4 = in_channels = 8.
    x1 = jax.random.normal(kx1, (2, 4, 8, 8), jnp.float32)
    x2 = jax.random.normal(kx2, (2, 4, 16, 16), jnp.float32)

    out = jax.block_until_ready(up_forward_pallas(x1, x2, params))
    ref = jax.block_until_ready(up_forward_ref(x1, x2, params))

    assert out.shape == (2, out_channels, 16, 16), out.shape
    # Kernel matmul operands are bf16 (per perf guidance); accumulation and
    # InstanceNorm math are f32.  Compare against the full-f32 reference with
    # a bf16-appropriate tolerance.
    assert jnp.allclose(out, ref, atol=5e-2, rtol=5e-2), \
        float(jnp.max(jnp.abs(out - ref)))

    print("KERNEL_OK")
</pallas_src>

<mosaic_0001>
module attributes {stable_mosaic.version = 11 : i64} {
  func.func @up_kernel(%arg0: i32, %arg1: memref<1x4x64xbf16, #tpu.memory_space<vmem>>, %arg2: memref<1x4x256xbf16, #tpu.memory_space<vmem>>, %arg3: memref<64x256xbf16, #tpu.memory_space<vmem>>, %arg4: memref<4x72xbf16, #tpu.memory_space<vmem>>, %arg5: memref<4x1xf32, #tpu.memory_space<vmem>>, %arg6: memref<4x1xf32, #tpu.memory_space<vmem>>, %arg7: memref<4x36xbf16, #tpu.memory_space<vmem>>, %arg8: memref<4x1xf32, #tpu.memory_space<vmem>>, %arg9: memref<4x1xf32, #tpu.memory_space<vmem>>, %arg10: memref<1x4x256xf32, #tpu.memory_space<vmem>>, %arg11: memref<8x512xf32, #tpu.memory_space<vmem>>, %arg12: memref<72x256xbf16, #tpu.memory_space<vmem>>) attributes {dimension_semantics = [#tpu.dimension_semantics<parallel>], iteration_bounds = array<i64: 2>, scalar_prefetch = 0 : i64, scratch_operands = 2 : i64, tpu.core_type = #tpu.core_type<tc>, window_params = [{transform_indices = @transform_0, window_bounds = array<i64: 1, 4, 64>}, {transform_indices = @transform_1, window_bounds = array<i64: 1, 4, 256>}, {pipeline_mode = #tpu.pipeline_mode<synchronous>, transform_indices = @transform_2, window_bounds = array<i64: 64, 256>}, {pipeline_mode = #tpu.pipeline_mode<synchronous>, transform_indices = @transform_3, window_bounds = array<i64: 4, 72>}, {pipeline_mode = #tpu.pipeline_mode<synchronous>, transform_indices = @transform_4, window_bounds = array<i64: 4, 1>}, {pipeline_mode = #tpu.pipeline_mode<synchronous>, transform_indices = @transform_5, window_bounds = array<i64: 4, 1>}, {pipeline_mode = #tpu.pipeline_mode<synchronous>, transform_indices = @transform_6, window_bounds = array<i64: 4, 36>}, {pipeline_mode = #tpu.pipeline_mode<synchronous>, transform_indices = @transform_7, window_bounds = array<i64: 4, 1>}, {pipeline_mode = #tpu.pipeline_mode<synchronous>, transform_indices = @transform_8, window_bounds = array<i64: 4, 1>}, {transform_indices = @transform_9, window_bounds = array<i64: 1, 4, 256>}]} {
    %cst = arith.constant 0.000000e+00 : f32
    %0 = vector.broadcast %cst : f32 to vector<8x128xf32>
    %c0 = arith.constant 0 : index
    %c0_0 = arith.constant 0 : index
    %1 = vector.load %arg11[%c0, %c0_0] : memref<8x512xf32, #tpu.memory_space<vmem>>, vector<8x128xf32>
    tpu.vector_store %arg11[%c0, %c0_0], %0 {strides = array<i32>} : memref<8x512xf32, #tpu.memory_space<vmem>>, vector<8x128xf32>,
    %c0_1 = arith.constant 0 : index
    %c384 = arith.constant 384 : index
    %2 = vector.load %arg11[%c0_1, %c384] : memref<8x512xf32, #tpu.memory_space<vmem>>, vector<8x128xf32>
    tpu.vector_store %arg11[%c0_1, %c384], %0 {strides = array<i32>} : memref<8x512xf32, #tpu.memory_space<vmem>>, vector<8x128xf32>,
    %3 = tpu.iota {dimensions = array<i32: 1>} : vector<1x256xi32>
    %c16_i32 = arith.constant 16 : i32
    %c0_i32 = arith.constant 0 : i32
    %4 = arith.cmpi eq, %c16_i32, %c0_i32 : i32
    %c1_i32 = arith.constant 1 : i32
    %5 = arith.select %4, %c1_i32, %c16_i32 : i32
    %6 = vector.broadcast %5 : i32 to vector<1x256xi32>
    %7 = arith.remsi %3, %6 : vector<1x256xi32>
    %c0_i32_2 = arith.constant 0 : i32
    %8 = vector.broadcast %c0_i32_2 : i32 to vector<1x256xi32>
    %9 = arith.cmpi ne, %7, %8 : vector<1x256xi32>
    %c0_i32_3 = arith.constant 0 : i32
    %10 = vector.broadcast %c0_i32_3 : i32 to vector<1x256xi32>
    %11 = arith.cmpi slt, %7, %10 : vector<1x256xi32>
    %c0_i32_4 = arith.constant 0 : i32
    %12 = arith.cmpi slt, %5, %c0_i32_4 : i32
    %13 = vector.broadcast %12 : i1 to vector<1x256xi1>
    %14 = vector.broadcast %13 : vector<1x256xi1> to vector<1x256xi1>
    %15 = arith.xori %11, %14 : vector<1x256xi1>
    %16 = arith.andi %15, %9 : vector<1x256xi1>
    %17 = vector.broadcast %5 : i32 to vector<1x256xi32>
    %18 = arith.addi %7, %17 : vector<1x256xi32>
    %19 = arith.select %16, %18, %7 : vector<1x256xi1>, vector<1x256xi32>
    %c0_i32_5 = arith.constant 0 : i32
    %20 = vector.broadcast %c0_i32_5 : i32 to vector<1x256xi32>
    %21 = arith.cmpi ne, %19, %20 : vector<1x256xi32>
    %22 = arith.extui %21 : vector<1x256xi1> to vector<1x256xi32>
    %23 = arith.sitofp %22 : vector<1x256xi32> to vector<1x256xf32>
    %c15_i32 = arith.constant 15 : i32
    %24 = vector.broadcast %c15_i32 : i32 to vector<1x256xi32>
    %25 = arith.cmpi ne, %19, %24 : vector<1x256xi32>
    %26 = arith.extui %25 : vector<1x256xi1> to vector<1x256xi32>
    %27 = arith.sitofp %26 : vector<1x256xi32> to vector<1x256xf32>
    %c0_6 = arith.constant 0 : index
    %c0_7 = arith.constant 0 : index
    %c0_8 = arith.constant 0 : index
    %28 = vector.load %arg1[%c0_6, %c0_7, %c0_8] : memref<1x4x64xbf16, #tpu.memory_space<vmem>>, vector<1x4x64xbf16>
    %29 = vector.shape_cast %28 : vector<1x4x64xbf16> to vector<4x64xbf16>
    %c0_9 = arith.constant 0 : index
    %c0_10 = arith.constant 0 : index
    %30 = vector.load %arg3[%c0_9, %c0_10] : memref<64x256xbf16, #tpu.memory_space<vmem>>, vector<64x256xbf16>
    %cst_11 = arith.constant dense<0.000000e+00> : vector<4x256xf32>
    %31 = tpu.matmul %29, %30, %cst_11 {dimension_numbers = #tpu.dot_dimension_numbers<[1], [0], [0], [1], [0, 0, 1, 1], [], []>} : vector<4x64xbf16>, vector<64x256xbf16>, vector<4x256xf32> -> vector<4x256xf32>
    %c0_12 = arith.constant 0 : index
    %c0_13 = arith.constant 0 : index
    %c0_14 = arith.constant 0 : index
    %32 = vector.load %arg2[%c0_12, %c0_13, %c0_14] : memref<1x4x256xbf16, #tpu.memory_space<vmem>>, vector<1x4x256xbf16>
    %33 = vector.shape_cast %32 : vector<1x4x256xbf16> to vector<4x256xbf16>
    %34 = arith.extf %33 : vector<4x256xbf16> to vector<4x256xf32>
    %c0_15 = arith.constant 0 : index
    %c128 = arith.constant 128 : index
    %35 = vector.load %arg11[%c0_15, %c128] : memref<8x512xf32, #tpu.memory_space<vmem>>, vector<4x256xf32>
    tpu.vector_store %arg11[%c0_15, %c128], %34 {strides = array<i32>} : memref<8x512xf32, #tpu.memory_space<vmem>>, vector<4x256xf32>,
    %c4 = arith.constant 4 : index
    %c128_16 = arith.constant 128 : index
    %36 = vector.load %arg11[%c4, %c128_16] : memref<8x512xf32, #tpu.memory_space<vmem>>, vector<4x256xf32>
    tpu.vector_store %arg11[%c4, %c128_16], %31 {strides = array<i32>} : memref<8x512xf32, #tpu.memory_space<vmem>>, vector<4x256xf32>,
    %c0_17 = arith.constant 0 : index
    %c111 = arith.constant 111 : index
    %37 = vector.load %arg11[%c0_17, %c111] : memref<8x512xf32, #tpu.memory_space<vmem>>, vector<8x256xf32>
    %38 = vector.broadcast %23 : vector<1x256xf32> to vector<8x256xf32>
    %39 = arith.mulf %37, %38 : vector<8x256xf32>
    %40 = arith.truncf %39 : vector<8x256xf32> to vector<8x256xbf16>
    %c0_18 = arith.constant 0 : index
    %c0_19 = arith.constant 0 : index
    %41 = vector.load %arg12[%c0_18, %c0_19] : memref<72x256xbf16, #tpu.memory_space<vmem>>, vector<8x256xbf16>
    tpu.vector_store %arg12[%c0_18, %c0_19], %40 {strides = array<i32>} : memref<72x256xbf16, #tpu.memory_space<vmem>>, vector<8x256xbf16>,
    %c0_20 = arith.constant 0 : index
    %c112 = arith.constant 112 : index
    %42 = vector.load %arg11[%c0_20, %c112] : memref<8x512xf32, #tpu.memory_space<vmem>>, vector<8x256xf32>
    %43 = arith.truncf %42 : vector<8x256xf32> to vector<8x256xbf16>
    %c8 = arith.constant 8 : index
    %c0_21 = arith.constant 0 : index
    %44 = vector.load %arg12[%c8, %c0_21] : memref<72x256xbf16, #tpu.memory_space<vmem>>, vector<8x256xbf16>
    tpu.vector_store %arg12[%c8, %c0_21], %43 {strides = array<i32>} : memref<72x256xbf16, #tpu.memory_space<vmem>>, vector<8x256xbf16>,
    %c0_22 = arith.constant 0 : index
    %c113 = arith.constant 113 : index
    %45 = vector.load %arg11[%c0_22, %c113] : memref<8x512xf32, #tpu.memory_space<vmem>>, vector<8x256xf32>
    %46 = vector.broadcast %27 : vector<1x256xf32> to vector<8x256xf32>
    %47 = arith.mulf %45, %46 : vector<8x256xf32>
    %48 = arith.truncf %47 : vector<8x256xf32> to vector<8x256xbf16>
    %c16 = arith.constant 16 : index
    %c0_23 = arith.constant 0 : index
    %49 = vector.load %arg12[%c16, %c0_23] : memref<72x256xbf16, #tpu.memory_space<vmem>>, vector<8x256xbf16>
    tpu.vector_store %arg12[%c16, %c0_23], %48 {strides = array<i32>} : memref<72x256xbf16, #tpu.memory_space<vmem>>, vector<8x256xbf16>,
    %c0_24 = arith.constant 0 : index
    %c127 = arith.constant 127 : index
    %50 = vector.load %arg11[%c0_24, %c127] : memref<8x512xf32, #tpu.memory_space<vmem>>, vector<8x256xf32>
    %51 = vector.broadcast %23 : vector<1x256xf32> to vector<8x256xf32>
    %52 = arith.mulf %50, %51 : vector<8x256xf32>
    %53 = arith.truncf %52 : vector<8x256xf32> to vector<8x256xbf16>
    %c24 = arith.constant 24 : index
    %c0_25 = arith.constant 0 : index
    %54 = vector.load %arg12[%c24, %c0_25] : memref<72x256xbf16, #tpu.memory_space<vmem>>, vector<8x256xbf16>
    tpu.vector_store %arg12[%c24, %c0_25], %53 {strides = array<i32>} : memref<72x256xbf16, #tpu.memory_space<vmem>>, vector<8x256xbf16>,
    %c0_26 = arith.constant 0 : index
    %c128_27 = arith.constant 128 : index
    %55 = vector.load %arg11[%c0_26, %c128_27] : memref<8x512xf32, #tpu.memory_space<vmem>>, vector<8x256xf32>
    %56 = arith.truncf %55 : vector<8x256xf32> to vector<8x256xbf16>
    %c32 = arith.constant 32 : index
    %c0_28 = arith.constant 0 : index
    %57 = vector.load %arg12[%c32, %c0_28] : memref<72x256xbf16, #tpu.memory_space<vmem>>, vector<8x256xbf16>
    tpu.vector_store %arg12[%c32, %c0_28], %56 {strides = array<i32>} : memref<72x256xbf16, #tpu.memory_space<vmem>>, vector<8x256xbf16>,
    %c0_29 = arith.constant 0 : index
    %c129 = arith.constant 129 : index
    %58 = vector.load %arg11[%c0_29, %c129] : memref<8x512xf32, #tpu.memory_space<vmem>>, vector<8x256xf32>
    %59 = vector.broadcast %27 : vector<1x256xf32> to vector<8x256xf32>
    %60 = arith.mulf %58, %59 : vector<8x256xf32>
    %61 = arith.truncf %60 : vector<8x256xf32> to vector<8x256xbf16>
    %c40 = arith.constant 40 : index
    %c0_30 = arith.constant 0 : index
    %62 = vector.load %arg12[%c40, %c0_30] : memref<72x256xbf16, #tpu.memory_space<vmem>>, vector<8x256xbf16>
    tpu.vector_store %arg12[%c40, %c0_30], %61 {strides = array<i32>} : memref<72x256xbf16, #tpu.memory_space<vmem>>, vector<8x256xbf16>,
    %c0_31 = arith.constant 0 : index
    %c143 = arith.constant 143 : index
    %63 = vector.load %arg11[%c0_31, %c143] : memref<8x512xf32, #tpu.memory_space<vmem>>, vector<8x256xf32>
    %64 = vector.broadcast %23 : vector<1x256xf32> to vector<8x256xf32>
    %65 = arith.mulf %63, %64 : vector<8x256xf32>
    %66 = arith.truncf %65 : vector<8x256xf32> to vector<8x256xbf16>
    %c48 = arith.constant 48 : index
    %c0_32 = arith.constant 0 : index
    %67 = vector.load %arg12[%c48, %c0_32] : memref<72x256xbf16, #tpu.memory_space<vmem>>, vector<8x256xbf16>
    tpu.vector_store %arg12[%c48, %c0_32], %66 {strides = array<i32>} : memref<72x256xbf16, #tpu.memory_space<vmem>>, vector<8x256xbf16>,
    %c0_33 = arith.constant 0 : index
    %c144 = arith.constant 144 : index
    %68 = vector.load %arg11[%c0_33, %c144] : memref<8x512xf32, #tpu.memory_space<vmem>>, vector<8x256xf32>
    %69 = arith.truncf %68 : vector<8x256xf32> to vector<8x256xbf16>
    %c56 = arith.constant 56 : index
    %c0_34 = arith.constant 0 : index
    %70 = vector.load %arg12[%c56, %c0_34] : memref<72x256xbf16, #tpu.memory_space<vmem>>, vector<8x256xbf16>
    tpu.vector_store %arg12[%c56, %c0_34], %69 {strides = array<i32>} : memref<72x256xbf16, #tpu.memory_space<vmem>>, vector<8x256xbf16>,
    %c0_35 = arith.constant 0 : index
    %c145 = arith.constant 145 : index
    %71 = vector.load %arg11[%c0_35, %c145] : memref<8x512xf32, #tpu.memory_space<vmem>>, vector<8x256xf32>
    %72 = vector.broadcast %27 : vector<1x256xf32> to vector<8x256xf32>
    %73 = arith.mulf %71, %72 : vector<8x256xf32>
    %74 = arith.truncf %73 : vector<8x256xf32> to vector<8x256xbf16>
    %c64 = arith.constant 64 : index
    %c0_36 = arith.constant 0 : index
    %75 = vector.load %arg12[%c64, %c0_36] : memref<72x256xbf16, #tpu.memory_space<vmem>>, vector<8x256xbf16>
    tpu.vector_store %arg12[%c64, %c0_36], %74 {strides = array<i32>} : memref<72x256xbf16, #tpu.memory_space<vmem>>, vector<8x256xbf16>,
    %c0_37 = arith.constant 0 : index
    %c0_38 = arith.constant 0 : index
    %76 = vector.load %arg4[%c0_37, %c0_38] : memref<4x72xbf16, #tpu.memory_space<vmem>>, vector<4x72xbf16>
    %c0_39 = arith.constant 0 : index
    %c0_40 = arith.constant 0 : index
    %77 = vector.load %arg12[%c0_39, %c0_40] : memref<72x256xbf16, #tpu.memory_space<vmem>>, vector<72x256xbf16>
    %cst_41 = arith.constant dense<0.000000e+00> : vector<4x256xf32>
    %78 = tpu.matmul %76, %77, %cst_41 {dimension_numbers = #tpu.dot_dimension_numbers<[1], [0], [0], [1], [0, 0, 1, 1], [], []>} : vector<4x72xbf16>, vector<72x256xbf16>, vector<4x256xf32> -> vector<4x256xf32>
    %cst_42 = arith.constant dense<0.000000e+00> : vector<4xf32>
    %79 = vector.multi_reduction <add>, %78, %cst_42 [1] : vector<4x256xf32> to vector<4xf32>
    %80 = vector.shape_cast %79 : vector<4xf32> to vector<4x1xf32>
    %cst_43 = arith.constant 2.560000e+02 : f32
    %81 = vector.broadcast %cst_43 : f32 to vector<4x1xf32>
    %82 = arith.divf %80, %81 : vector<4x1xf32>
    %83 = vector.broadcast %82 : vector<4x1xf32> to vector<4x256xf32>
    %84 = arith.subf %78, %83 : vector<4x256xf32>
    %85 = arith.mulf %84, %84 : vector<4x256xf32>
    %cst_44 = arith.constant dense<0.000000e+00> : vector<4xf32>
    %86 = vector.multi_reduction <add>, %85, %cst_44 [1] : vector<4x256xf32> to vector<4xf32>
    %87 = vector.shape_cast %86 : vector<4xf32> to vector<4x1xf32>
    %cst_45 = arith.constant 2.560000e+02 : f32
    %88 = vector.broadcast %cst_45 : f32 to vector<4x1xf32>
    %89 = arith.divf %87, %88 : vector<4x1xf32>
    %cst_46 = arith.constant 9.99999974E-6 : f32
    %90 = vector.broadcast %cst_46 : f32 to vector<4x1xf32>
    %91 = arith.addf %89, %90 : vector<4x1xf32>
    %92 = math.rsqrt %91 : vector<4x1xf32>
    %93 = vector.broadcast %92 : vector<4x1xf32> to vector<4x256xf32>
    %94 = arith.mulf %84, %93 : vector<4x256xf32>
    %c0_47 = arith.constant 0 : index
    %c0_48 = arith.constant 0 : index
    %95 = vector.load %arg5[%c0_47, %c0_48] : memref<4x1xf32, #tpu.memory_space<vmem>>, vector<4x1xf32>
    %96 = vector.broadcast %95 : vector<4x1xf32> to vector<4x256xf32>
    %97 = arith.mulf %94, %96 : vector<4x256xf32>
    %c0_49 = arith.constant 0 : index
    %c0_50 = arith.constant 0 : index
    %98 = vector.load %arg6[%c0_49, %c0_50] : memref<4x1xf32, #tpu.memory_space<vmem>>, vector<4x1xf32>
    %99 = vector.broadcast %98 : vector<4x1xf32> to vector<4x256xf32>
    %100 = arith.addf %97, %99 : vector<4x256xf32>
    %cst_51 = arith.constant 0.000000e+00 : f32
    %101 = vector.broadcast %cst_51 : f32 to vector<4x256xf32>
    %102 = arith.maximumf %100, %101 : vector<4x256xf32>
    %c0_52 = arith.constant 0 : index
    %c128_53 = arith.constant 128 : index
    %103 = vector.load %arg11[%c0_52, %c128_53] : memref<8x512xf32, #tpu.memory_space<vmem>>, vector<4x256xf32>
    tpu.vector_store %arg11[%c0_52, %c128_53], %102 {strides = array<i32>} : memref<8x512xf32, #tpu.memory_space<vmem>>, vector<4x256xf32>,
    %c0_54 = arith.constant 0 : index
    %c111_55 = arith.constant 111 : index
    %104 = vector.load %arg11[%c0_54, %c111_55] : memref<8x512xf32, #tpu.memory_space<vmem>>, vector<4x256xf32>
    %105 = vector.broadcast %23 : vector<1x256xf32> to vector<4x256xf32>
    %106 = arith.mulf %104, %105 : vector<4x256xf32>
    %107 = arith.truncf %106 : vector<4x256xf32> to vector<4x256xbf16>
    %c0_56 = arith.constant 0 : index
    %c0_57 = arith.constant 0 : index
    %108 = vector.load %arg12[%c0_56, %c0_57] : memref<72x256xbf16, #tpu.memory_space<vmem>>, vector<4x256xbf16>
    tpu.vector_store %arg12[%c0_56, %c0_57], %107 {strides = array<i32>} : memref<72x256xbf16, #tpu.memory_space<vmem>>, vector<4x256xbf16>,
    %c0_58 = arith.constant 0 : index
    %c112_59 = arith.constant 112 : index
    %109 = vector.load %arg11[%c0_58, %c112_59] : memref<8x512xf32, #tpu.memory_space<vmem>>, vector<4x256xf32>
    %110 = arith.truncf %109 : vector<4x256xf32> to vector<4x256xbf16>
    %c4_60 = arith.constant 4 : index
    %c0_61 = arith.constant 0 : index
    %111 = vector.load %arg12[%c4_60, %c0_61] : memref<72x256xbf16, #tpu.memory_space<vmem>>, vector<4x256xbf16>
    tpu.vector_store %arg12[%c4_60, %c0_61], %110 {strides = array<i32>} : memref<72x256xbf16, #tpu.memory_space<vmem>>, vector<4x256xbf16>,
    %c0_62 = arith.constant 0 : index
    %c113_63 = arith.constant 113 : index
    %112 = vector.load %arg11[%c0_62, %c113_63] : memref<8x512xf32, #tpu.memory_space<vmem>>, vector<4x256xf32>
    %113 = vector.broadcast %27 : vector<1x256xf32> to vector<4x256xf32>
    %114 = arith.mulf %112, %113 : vector<4x256xf32>
    %115 = arith.truncf %114 : vector<4x256xf32> to vector<4x256xbf16>
    %c8_64 = arith.constant 8 : index
    %c0_65 = arith.constant 0 : index
    %116 = vector.load %arg12[%c8_64, %c0_65] : memref<72x256xbf16, #tpu.memory_space<vmem>>, vector<4x256xbf16>
    tpu.vector_store %arg12[%c8_64, %c0_65], %115 {strides = array<i32>} : memref<72x256xbf16, #tpu.memory_space<vmem>>, vector<4x256xbf16>,
    %c0_66 = arith.constant 0 : index
    %c127_67 = arith.constant 127 : index
    %117 = vector.load %arg11[%c0_66, %c127_67] : memref<8x512xf32, #tpu.memory_space<vmem>>, vector<4x256xf32>
    %118 = vector.broadcast %23 : vector<1x256xf32> to vector<4x256xf32>
    %119 = arith.mulf %117, %118 : vector<4x256xf32>
    %120 = arith.truncf %119 : vector<4x256xf32> to vector<4x256xbf16>
    %c12 = arith.constant 12 : index
    %c0_68 = arith.constant 0 : index
    %121 = vector.load %arg12[%c12, %c0_68] : memref<72x256xbf16, #tpu.memory_space<vmem>>, vector<4x256xbf16>
    tpu.vector_store %arg12[%c12, %c0_68], %120 {strides = array<i32>} : memref<72x256xbf16, #tpu.memory_space<vmem>>, vector<4x256xbf16>,
    %c0_69 = arith.constant 0 : index
    %c128_70 = arith.constant 128 : index
    %122 = vector.load %arg11[%c0_69, %c128_70] : memref<8x512xf32, #tpu.memory_space<vmem>>, vector<4x256xf32>
    %123 = arith.truncf %122 : vector<4x256xf32> to vector<4x256xbf16>
    %c16_71 = arith.constant 16 : index
    %c0_72 = arith.constant 0 : index
    %124 = vector.load %arg12[%c16_71, %c0_72] : memref<72x256xbf16, #tpu.memory_space<vmem>>, vector<4x256xbf16>
    tpu.vector_store %arg12[%c16_71, %c0_72], %123 {strides = array<i32>} : memref<72x256xbf16, #tpu.memory_space<vmem>>, vector<4x256xbf16>,
    %c0_73 = arith.constant 0 : index
    %c129_74 = arith.constant 129 : index
    %125 = vector.load %arg11[%c0_73, %c129_74] : memref<8x512xf32, #tpu.memory_space<vmem>>, vector<4x256xf32>
    %126 = vector.broadcast %27 : vector<1x256xf32> to vector<4x256xf32>
    %127 = arith.mulf %125, %126 : vector<4x256xf32>
    %128 = arith.truncf %127 : vector<4x256xf32> to vector<4x256xbf16>
    %c20 = arith.constant 20 : index
    %c0_75 = arith.constant 0 : index
    %129 = vector.load %arg12[%c20, %c0_75] : memref<72x256xbf16, #tpu.memory_space<vmem>>, vector<4x256xbf16>
    tpu.vector_store %arg12[%c20, %c0_75], %128 {strides = array<i32>} : memref<72x256xbf16, #tpu.memory_space<vmem>>, vector<4x256xbf16>,
    %c0_76 = arith.constant 0 : index
    %c143_77 = arith.constant 143 : index
    %130 = vector.load %arg11[%c0_76, %c143_77] : memref<8x512xf32, #tpu.memory_space<vmem>>, vector<4x256xf32>
    %131 = vector.broadcast %23 : vector<1x256xf32> to vector<4x256xf32>
    %132 = arith.mulf %130, %131 : vector<4x256xf32>
    %133 = arith.truncf %132 : vector<4x256xf32> to vector<4x256xbf16>
    %c24_78 = arith.constant 24 : index
    %c0_79 = arith.constant 0 : index
    %134 = vector.load %arg12[%c24_78, %c0_79] : memref<72x256xbf16, #tpu.memory_space<vmem>>, vector<4x256xbf16>
    tpu.vector_store %arg12[%c24_78, %c0_79], %133 {strides = array<i32>} : memref<72x256xbf16, #tpu.memory_space<vmem>>, vector<4x256xbf16>,
    %c0_80 = arith.constant 0 : index
    %c144_81 = arith.constant 144 : index
    %135 = vector.load %arg11[%c0_80, %c144_81] : memref<8x512xf32, #tpu.memory_space<vmem>>, vector<4x256xf32>
    %136 = arith.truncf %135 : vector<4x256xf32> to vector<4x256xbf16>
    %c28 = arith.constant 28 : index
    %c0_82 = arith.constant 0 : index
    %137 = vector.load %arg12[%c28, %c0_82] : memref<72x256xbf16, #tpu.memory_space<vmem>>, vector<4x256xbf16>
    tpu.vector_store %arg12[%c28, %c0_82], %136 {strides = array<i32>} : memref<72x256xbf16, #tpu.memory_space<vmem>>, vector<4x256xbf16>,
    %c0_83 = arith.constant 0 : index
    %c145_84 = arith.constant 145 : index
    %138 = vector.load %arg11[%c0_83, %c145_84] : memref<8x512xf32, #tpu.memory_space<vmem>>, vector<4x256xf32>
    %139 = vector.broadcast %27 : vector<1x256xf32> to vector<4x256xf32>
    %140 = arith.mulf %138, %139 : vector<4x256xf32>
    %141 = arith.truncf %140 : vector<4x256xf32> to vector<4x256xbf16>
    %c32_85 = arith.constant 32 : index
    %c0_86 = arith.constant 0 : index
    %142 = vector.load %arg12[%c32_85, %c0_86] : memref<72x256xbf16, #tpu.memory_space<vmem>>, vector<4x256xbf16>
    tpu.vector_store %arg12[%c32_85, %c0_86], %141 {strides = array<i32>} : memref<72x256xbf16, #tpu.memory_space<vmem>>, vector<4x256xbf16>,
    %c0_87 = arith.constant 0 : index
    %c0_88 = arith.constant 0 : index
    %143 = vector.load %arg7[%c0_87, %c0_88] : memref<4x36xbf16, #tpu.memory_space<vmem>>, vector<4x36xbf16>
    %c0_89 = arith.constant 0 : index
    %c0_90 = arith.constant 0 : index
    %144 = vector.load %arg12[%c0_89, %c0_90] : memref<72x256xbf16, #tpu.memory_space<vmem>>, vector<36x256xbf16>
    %cst_91 = arith.constant dense<0.000000e+00> : vector<4x256xf32>
    %145 = tpu.matmul %143, %144, %cst_91 {dimension_numbers = #tpu.dot_dimension_numbers<[1], [0], [0], [1], [0, 0, 1, 1], [], []>} : vector<4x36xbf16>, vector<36x256xbf16>, vector<4x256xf32> -> vector<4x256xf32>
    %cst_92 = arith.constant dense<0.000000e+00> : vector<4xf32>
    %146 = vector.multi_reduction <add>, %145, %cst_92 [1] : vector<4x256xf32> to vector<4xf32>
    %147 = vector.shape_cast %146 : vector<4xf32> to vector<4x1xf32>
    %cst_93 = arith.constant 2.560000e+02 : f32
    %148 = vector.broadcast %cst_93 : f32 to vector<4x1xf32>
    %149 = arith.divf %147, %148 : vector<4x1xf32>
    %150 = vector.broadcast %149 : vector<4x1xf32> to vector<4x256xf32>
    %151 = arith.subf %145, %150 : vector<4x256xf32>
    %152 = arith.mulf %151, %151 : vector<4x256xf32>
    %cst_94 = arith.constant dense<0.000000e+00> : vector<4xf32>
    %153 = vector.multi_reduction <add>, %152, %cst_94 [1] : vector<4x256xf32> to vector<4xf32>
    %154 = vector.shape_cast %153 : vector<4xf32> to vector<4x1xf32>
    %cst_95 = arith.constant 2.560000e+02 : f32
    %155 = vector.broadcast %cst_95 : f32 to vector<4x1xf32>
    %156 = arith.divf %154, %155 : vector<4x1xf32>
    %cst_96 = arith.constant 9.99999974E-6 : f32
    %157 = vector.broadcast %cst_96 : f32 to vector<4x1xf32>
    %158 = arith.addf %156, %157 : vector<4x1xf32>
    %159 = math.rsqrt %158 : vector<4x1xf32>
    %160 = vector.broadcast %159 : vector<4x1xf32> to vector<4x256xf32>
    %161 = arith.mulf %151, %160 : vector<4x256xf32>
    %c0_97 = arith.constant 0 : index
    %c0_98 = arith.constant 0 : index
    %162 = vector.load %arg8[%c0_97, %c0_98] : memref<4x1xf32, #tpu.memory_space<vmem>>, vector<4x1xf32>
    %163 = vector.broadcast %162 : vector<4x1xf32> to vector<4x256xf32>
    %164 = arith.mulf %161, %163 : vector<4x256xf32>
    %c0_99 = arith.constant 0 : index
    %c0_100 = arith.constant 0 : index
    %165 = vector.load %arg9[%c0_99, %c0_100] : memref<4x1xf32, #tpu.memory_space<vmem>>, vector<4x1xf32>
    %166 = vector.broadcast %165 : vector<4x1xf32> to vector<4x256xf32>
    %167 = arith.addf %164, %166 : vector<4x256xf32>
    %cst_101 = arith.constant 0.000000e+00 : f32
    %168 = vector.broadcast %cst_101 : f32 to vector<4x256xf32>
    %169 = arith.maximumf %167, %168 : vector<4x256xf32>
    %c0_102 = arith.constant 0 : index
    %c0_103 = arith.constant 0 : index
    %c0_104 = arith.constant 0 : index
    %170 = vector.load %arg10[%c0_102, %c0_103, %c0_104] : memref<1x4x256xf32, #tpu.memory_space<vmem>>, vector<1x4x256xf32>
    %171 = vector.shape_cast %170 : vector<1x4x256xf32> to vector<4x256xf32>
    %172 = vector.shape_cast %169 : vector<4x256xf32> to vector<1x4x256xf32>
    tpu.vector_store %arg10[%c0_102, %c0_103, %c0_104], %172 {strides = array<i32>} : memref<1x4x256xf32, #tpu.memory_space<vmem>>, vector<1x4x256xf32>,
    return
  }
  func.func @transform_0(%arg0: i32) -> (i32, i32, i32) {
    %c0_i32 = arith.constant 0 : i32
    %c0_i32_0 = arith.constant 0 : i32
    %c0_i32_1 = arith.constant 0 : i32
    return %arg0, %c0_i32, %c0_i32_0 : i32, i32, i32
  }
  func.func @transform_1(%arg0: i32) -> (i32, i32, i32) {
    %c0_i32 = arith.constant 0 : i32
    %c0_i32_0 = arith.constant 0 : i32
    %c0_i32_1 = arith.constant 0 : i32
    return %arg0, %c0_i32, %c0_i32_0 : i32, i32, i32
  }
  func.func @transform_2(%arg0: i32) -> (i32, i32) {
    %c0_i32 = arith.constant 0 : i32
    %c0_i32_0 = arith.constant 0 : i32
    %c0_i32_1 = arith.constant 0 : i32
    return %c0_i32, %c0_i32_0 : i32, i32
  }
  func.func @transform_3(%arg0: i32) -> (i32, i32) {
    %c0_i32 = arith.constant 0 : i32
    %c0_i32_0 = arith.constant 0 : i32
    %c0_i32_1 = arith.constant 0 : i32
    return %c0_i32, %c0_i32_0 : i32, i32
  }
  func.func @transform_4(%arg0: i32) -> (i32, i32) {
    %c0_i32 = arith.constant 0 : i32
    %c0_i32_0 = arith.constant 0 : i32
    %c0_i32_1 = arith.constant 0 : i32
    return %c0_i32, %c0_i32_0 : i32, i32
  }
  func.func @transform_5(%arg0: i32) -> (i32, i32) {
    %c0_i32 = arith.constant 0 : i32
    %c0_i32_0 = arith.constant 0 : i32
    %c0_i32_1 = arith.constant 0 : i32
    return %c0_i32, %c0_i32_0 : i32, i32
  }
  func.func @transform_6(%arg0: i32) -> (i32, i32) {
    %c0_i32 = arith.constant 0 : i32
    %c0_i32_0 = arith.constant 0 : i32
    %c0_i32_1 = arith.constant 0 : i32
    return %c0_i32, %c0_i32_0 : i32, i32
  }
  func.func @transform_7(%arg0: i32) -> (i32, i32) {
    %c0_i32 = arith.constant 0 : i32
    %c0_i32_0 = arith.constant 0 : i32
    %c0_i32_1 = arith.constant 0 : i32
    return %c0_i32, %c0_i32_0 : i32, i32
  }
  func.func @transform_8(%arg0: i32) -> (i32, i32) {
    %c0_i32 = arith.constant 0 : i32
    %c0_i32_0 = arith.constant 0 : i32
    %c0_i32_1 = arith.constant 0 : i32
    return %c0_i32, %c0_i32_0 : i32, i32
  }
  func.func @transform_9(%arg0: i32) -> (i32, i32, i32) {
    %c0_i32 = arith.constant 0 : i32
    %c0_i32_0 = arith.constant 0 : i32
    %c0_i32_1 = arith.constant 0 : i32
    return %arg0, %c0_i32, %c0_i32_0 : i32, i32, i32
  }
}

</mosaic_0001>

<bundles_post_ra>
// kernel: tpu_custom_call.1
= control target key start
LH: loop header
LB: loop body
LE: loop exit
PB: predicated region body
PF: predicated region fallthrough
CT: control target
= control target key end

     0   :  { %14 = vsyncpa [#allocation5], 0  ;;  %s2169_s0 = inlined_call_operand.vmem [shape: bf16[2,4,64], index: 0, kind: input, shape index: {}]   ;;  %s2170_s1 = inlined_call_operand.vmem [shape: bf16[2,4,256], index: 1, kind: input, shape index: {}]   ;;  %s2171_s2 = inlined_call_operand.hbm [shape: bf16[64,256], index: 2, kind: input, shape index: {}]   ;;  %s2172_s3 = inlined_call_operand.vmem [shape: bf16[4,72], index: 3, kind: input, shape index: {}]   ;;  %s2173_s4 = inlined_call_operand.vmem [shape: f32[4,1], index: 4, kind: input, shape index: {}]   ;;  %s2174_s5 = inlined_call_operand.vmem [shape: f32[4,1], index: 5, kind: input, shape index: {}]   ;;  %s2175_s6 = inlined_call_operand.vmem [shape: bf16[4,36], index: 6, kind: input, shape index: {}]   ;;  %s2176_s7 = inlined_call_operand.vmem [shape: f32[4,1], index: 7, kind: input, shape index: {}]   ;;  %s2177_s8 = inlined_call_operand.vmem [shape: f32[4,1], index: 8, kind: input, shape index: {}]   ;;  %s2178_s9 = inlined_call_operand.hbm [shape: f32[2,4,256], index: 9, kind: output, shape index: {}]  }
   0x1   :  { %15 = vsyncpa [#allocation6], 0 }
   0x2   :  { %17 = vsyncpa [#allocation6 + $0x1], 0  ;;  %s1800_s30 = smov 0   ;;  %s1802_s10 = smov 0  }
   0x3   :  { %s1804_s11 = smov 0   ;;  %s1806_s12 = smov 0  }
   0x4 LB: > { %s1821_s13 = sadd.s32 4294967295, %s1733_s12   ;;  %s1403_s14 = sadd.s32 4294967294, %s1733_s12   ;;  %s1733_s12 = sphi %s1806_s12, %s2194_s12   ;;  %s1729_s11 = sphi %s1804_s11, %s2193_s11   ;;  %s1725_s10 = sphi %s1802_s10, %s2192_s10   ;;  %s1721_s30 = sphi %s1800_s30, %s2191_s30  }
   0x5   : > { %s1825_s15 = sadd.s32 1, %s1733_s12   ;;  %s229_s16 = sadd.s32 1, %s1729_s11 }
   0x6   : > { %s226_s17 = ssub.s32 %s1733_s12, %s1825_s15  ;;  %p239_p0 = scmp.ne.s32.totalorder %s1729_s11, %s1725_s10 }
   0x7   : > { %p227_p1 = scmp.eq.s32.totalorder %s226_s17, 0  ;;  %p240_p2 = scmp.eq.s32.totalorder %s1821_s13, 1 }
   0x8   : > { %p245_p3 = scmp.ne.s32.totalorder %s1725_s10, %s1721_s30  ;;  %p246_p4 = scmp.eq.s32.totalorder %s1403_s14, 1 }
   0x9   : > { %s1836_s18 = scalar_select %p227_p1, %s1729_s11, %s229_s16  }
   0xa   : > { %p1838_p5 = por %p240_p2, %p239_p0  ;;  %p1842_p6 = por %p246_p4, %p245_p3 }
   0xb   : > { %p1404_p7 = scmp.ge.s32.totalorder %s1733_s12, 1  ;;  %p253_p8 = scmp.lt.s32.totalorder %s1733_s12, 3 }
   0xc   : > { %s2182_s19 = scalar_select %p1838_p5, 1, 0 }
   0xd   : > { %s2183_s20 = scalar_select %p1842_p6, 1, 0 }
   0xe   : > { %p2179_p9 = scmp.eq.s32.totalorder %s1821_s13, 0  ;;  %p1849_p10 = pnand %p1404_p7, %p253_p8 }
   0xf   : > { %s1735_s22 = smov [#allocation4]   ;;  %s1639_s27 = scalar_lea.hbm %s2171_s2, 1024 }
  0x10   : > { %s2184_s21 = scalar_select %p1849_p10, 1, 0 }
  0x11   : > { %s265_s23 = sshll.u32 %s1735_s22, 4  ;;  %p1527_p11 = pneg %p1849_p10  ;;  %s266_s23 = int_to_ptr.vmem [resolvable:$true] %s265_s23 }
  0x12   : > { %p1640_p13 = scmp.ne.s32.totalorder %s2171_s2, %s1639_s27  ;;  %p1646_p3 = scmp.lt.u32.totalorder %s1639_s27, %s2171_s2 }
  0x13   : > { %p1857_p12 = pnand %p2179_p9, %p1527_p11 }
  0x15   : > { %p1641_p0 = pneg %p1857_p12 }
  0x17   : > { %p1642_p1 = pnand %p1641_p0, %p1640_p13 }
  0x19   : > { %p1643_p2 = pneg %p1642_p1 }
  0x1b   : > { %p1648_p4 = pnand %p1646_p3, %p1643_p2 }
  0x1d   : > { %1651 = shalt.err (!%p1648_p4)
}
  0x1e   : > { %s1652_s17 = scalar_lea.vmem %s266_s23, 1024  ;;  %p1660_p9 = scmp.lt.s32.totalorder %s266_s23, %s266_s23 }
  0x1f   : > { %p1653_p7 = scmp.ne.s32.totalorder %s266_s23, %s1652_s17  ;;  %p1661_p6 = scmp.lt.s32.totalorder %s1652_s17, %s1652_s17 }
  0x21   : > { %p1655_p8 = pnand %p1653_p7, %p1641_p0  ;;  %p1662_p5 = por %p1661_p6, %p1660_p9 }
  0x23   : > { %p1656_p11 = pneg %p1655_p8 }
  0x25   : > { %p1663_p10 = pnand %p1662_p5, %p1656_p11 }
  0x27   : > { %1666 = shalt.err (!%p1663_p10)
}
  0x28   : > { %s1736_s22 = smov 128   ;;  %s1737_s25 = smov 8  }
  0x29   : > { %1530 = dma.hbm_to_vmem [thread:$0]  (!%p1857_p12), %s2171_s2, 1024, %s266_s23, [#allocation5], %s1736_s22, %s1736_s22, %s1737_s25  }
  0x2a   : > { %p2186_p13 = scmp.ne.s32.totalorder %s2184_s21, 0 }
  0x2b   : > { %p2187_p1 = scmp.eq.s32.totalorder (!%p2186_p13), %s1821_s13, 0 }
  0x2c   : > { %314 = sbr.rel (%p2186_p13) target bundleno = 1708 (0x6ac), region = 56 }
  0x33   : > { %1712 = dma.done.wait (%p2187_p1), [#allocation5], 1024   ;;  %p2188_p0 = pmov %p2187_p1 }
  0x34   : > { %p354_p5 = scmp.lt.s32.totalorder %s1821_s13, 1  ;;  %v366_v0 = vlaneseq  ;;  %v1738_v1 = vmov 0   ;;  %v1739_v2 = vmov 0.0   ;;  %v1615_v7 = vld [vmem:[#allocation4 + $0x4] ss:$8 sps:$4 sm:$0xff]   ;;  %s1740_s14 = smov 127  }
  0x35   : > { %1714 = vsyncadd (%p2188_p0), [#allocation5], 4294966272  ;;  %490 = vmatprep.mubr.bf16.mxu0 %v1738_v1  ;;  %364 = vst [vmem:[#allocation2] sm:$0xff] %v1739_v2  ;;  %900 = vmatprep.mubr.bf16.mxu1 %v1738_v1  ;;  %v1617_v9 = vld [vmem:[#allocation4] ss:$8 sps:$4 sm:$0xff]   ;;  %s1741_s16 = smov 111  }
  0x36   : > { %365 = vst [vmem:[#allocation2 + $0x18] sm:$0xff] %v1739_v2  ;;  %v367_v3 = vand.u32 127, %v366_v0  ;;  %1614 = vset.pattern.permute.xlu1 %v1738_v1  ;;  %1613 = vset.pattern.permute.xlu0 %v1738_v1  ;;  %s1891_s21 = scalar_select %p354_p5, %s1821_s13, 1  ;;  %v1618_v10 = vld [vmem:[#allocation4 + $0x14] ss:$8 sps:$4 sm:$0xff]   ;;  %vm454_vm4 = vcmask 523264  }
  0x37   : > { %458 = vmatprep.subr.bf16.mxu0 %v1615_v7  ;;  %v1620_v13 = vld [vmem:[#allocation4 + $0x10] ss:$8 sps:$4 sm:$0xff]   ;;  %v1621_v16 = vld [vmem:[#allocation4 + $0x24] ss:$8 sps:$4 sm:$0xff]   ;;  %v1623_v20 = vld [vmem:[#allocation4 + $0x20] ss:$8 sps:$4 sm:$0xff]  }
  0x38   : > { %v368_v4 = vadd.s32 128, %v367_v3  ;;  %v373_v5 = vand.u32 15, %v367_v3  ;;  %s1485_s23 = sshll.u32 %s1891_s21, 2  ;;  %459 = vmatpush1.bf16.msra.mxu0 %v1617_v9  ;;  %v1624_v21 = vld [vmem:[#allocation4 + $0x34] ss:$8 sps:$4 sm:$0xff]   ;;  %s1410_s17 = sshll.u32 %s1891_s21, 1 }
  0x39   : > { %s362_s29 = scalar_lea.vmem %s2170_s1, %s1485_s23  ;;  %460 = vmatprep.subr.bf16.mxu0 %v1618_v10  ;;  %s1742_s22 = smov 1   ;;  %v1626_v23 = vld [vmem:[#allocation4 + $0x30] ss:$8 sps:$4 sm:$0xff]   ;;  %vm523_vm5 = vcmask 908288   ;;  %vm588_vm6 = vcmask 924672   ;;  %vm625_vm7 = vcmask 1039360  }
  0x3a   : > { %v380_v6 = vand.u32 15, %v368_v4  ;;  %vm393_vm0 = vcmp.ne.s32.totalorder %v373_v5, 0  ;;  %vm399_vm1 = vcmp.ne.s32.totalorder %v373_v5, 15  ;;  %v499_v17 = vld [vmem:[%s362_s29] sm:$0xf]  ;;  %s1743_s25 = smov 113   ;;  %s357_s23 = scalar_lea.vmem %s2169_s0, %s1410_s17 }
  0x3b   : > { %v1413_v8 = vsel %vm393_vm0, 1.0, %v1739_v2  ;;  %v1415_v12 = vsel %vm399_vm1, 1.0, %v1739_v2  ;;  %v500_v19 = vunpack.c.l.bf16 %v499_v17  ;;  %s1744_s24 = smov 17   ;;  %s1745_s27 = smov 15   ;;  %v405_v24 = vld [vmem:[%s357_s23] sm:$0x3] }
  0x3c   : > { %vm394_vm2 = vcmp.ne.s32.totalorder %v380_v6, 0  ;;  %vm400_vm3 = vcmp.ne.s32.totalorder %v380_v6, 15  ;;  %461 = vmatpush1.bf16.msra.mxu0 %v1620_v13  ;;  %s1746_s21 = smov 16   ;;  %vm651_vm8 = vcmask 7168   ;;  %vm614_vm9 = vcmask 121856   ;;  %s1747_s29 = smov 112  }
  0x3d   : > { %v1414_v11 = vsel %vm394_vm2, 1.0, %v1739_v2  ;;  %v1416_v15 = vsel %vm400_vm3, 1.0, %v1739_v2  ;;  %462 = vmatprep.subr.bf16.mxu0 %v1621_v16  ;;  %v502_v22 = vcombine.high %v500_v19, %v500_v19  ;;  %504 = vst [vmem:[#allocation2 + $0x8] sm:$0xf] %v500_v19  ;;  %vm550_vm10 = vcmask 138240   ;;  %s1520_s28 = sshll.u32 %s1821_s13, 7 }
  0x3e   : > { %v1593_v14 = vpack.i.bf16 %v1414_v11, %v1413_v8  ;;  %v1598_v18 = vpack.i.bf16 %v1416_v15, %v1415_v12  ;;  %vm548_vm11 = vcmask 1043456   ;;  %vm575_vm12 = vcmask 130048   ;;  %p2189_p9 = scmp.ne.s32.totalorder %s2182_s19, 0  ;;  %s1749_s13 = smov [#allocation7]  }
  0x3f   : > { %505 = vst [vmem:[#allocation2 + $0x10] sm:$0xf] %v502_v22  ;;  %vm761_vm13 = vcmask 916480   ;;  %vm857_vm14 = vcmask 588800   ;;  %vm1214_vm15 = vcmask 1041408   ;;  %vm1210_vm0 = vcmask 293888  }
  0x40   : > { %1594 = vrot.lane.b32.xlu1 %v1593_v14, %s1740_s14  ;;  %1584 = vrot.lane.b32.xlu0 %v1593_v14, %s1741_s16 }
  0x41   : > { %463 = vmatpush1.bf16.msra.mxu0 %v1623_v20 }
  0x42   : > { %464 = vmatprep.subr.bf16.mxu0 %v1624_v21  ;;  %v1748_v21 = vmov 0.0|0.0  }
  0x44   : > { %1599 = vrot.lane.b32.xlu1 %v1598_v18, %s1742_s22  ;;  %1589 = vrot.lane.b32.xlu0 %v1598_v18, %s1743_s25 }
  0x45   : > { %465 = vmatpush1.bf16.msra.mxu0 %v1626_v23 }
  0x48   : > { %1609 = vrot.lane.b32.xlu1 %v1598_v18, %s1744_s24  ;;  %1604 = vrot.lane.b32.xlu0 %v1593_v14, %s1745_s27 }
  0x49   : > { %1425 = vmatmul.mubr.msk.bf16.vlgmr.msra.gmra.mrb[0].mxu0 %vm454_vm4, %v405_v24 }
  0x4a   : > { %1253 = vmatprep.mubr.bf16.mxu0 %v1738_v1 }
  0xb2   : > { %v1595_v25 = vpop.permute.xlu1 %1594  ;;  %v1585_v31 = vpop.permute.xlu0 %1584 }
  0xb3   : > { %v1916_v37 = vunpack.i.h.bf16 %v1585_v31  ;;  %v1918_v38 = vunpack.i.l.bf16 %v1585_v31  ;;  %v1952_v52 = vunpack.i.h.bf16 %v1595_v25  ;;  %v1954_v53 = vunpack.i.l.bf16 %v1595_v25 }
  0xb5   : > { %v1923_v40 = vsel %vm523_vm5, %v1918_v38, %v1916_v37  ;;  %v528_v46 = vmul.f32 0.0, %v1918_v38  ;;  %v1967_v60 = vsel %vm625_vm7, %v1954_v53, %v1952_v52 }
  0xb6   : > { %v1600_v26 = vpop.permute.xlu1 %1599  ;;  %v1590_v39 = vpop.permute.xlu0 %1589 }
  0xb7   : > { %v1912_v27 = vunpack.i.h.bf16 %v1600_v26  ;;  %v1925_v41 = vunpack.i.h.bf16 %v1590_v39  ;;  %v1927_v42 = vunpack.i.l.bf16 %v1590_v39  ;;  %v1978_v3 = vunpack.i.l.bf16 %v1600_v26 }
  0xb9   : > { %v680_v28 = vmul.f32 0.0, %v1912_v27  ;;  %v1945_v49 = vsel %vm588_vm6, %v1927_v42, %v1925_v41  ;;  %v593_v55 = vmul.f32 0.0, %v1927_v42  ;;  %v1988_v9 = vsel %vm651_vm8, %v1978_v3, %v1912_v27 }
  0xba   : > { %v1605_v59 = vpop.permute.xlu0 %1604  ;;  %v1610_v8 = vpop.permute.xlu1 %1609 }
  0xbb   : > { %v1496_v29 = vpack.c.bf16 %v680_v28, %v680_v28  ;;  %v1972_v63 = vunpack.i.h.bf16 %v1605_v59  ;;  %v1982_v6 = vunpack.i.l.bf16 %v1605_v59  ;;  %v1995_v13 = vunpack.i.h.bf16 %v1610_v8 }
  0xbc   : > { %v1997_v14 = vunpack.i.l.bf16 %v1610_v8 }
  0xbd   : > { %694 = vrot.lane.b32.xlu1 %v1496_v29, %s1740_s14  ;;  %v717_v4 = vmul.f32 0.0, %v1972_v63  ;;  %v2002_v15 = vsel %vm614_vm9, %v1982_v6, %v1972_v63  ;;  %v779_v16 = vmul.f32 0.0, %v1995_v13 }
  0xbe   : > { %v2015_v20 = vsel %vm550_vm10, %v1997_v14, %v1995_v13 }
  0xbf   : > { %v1498_v10 = vpack.c.bf16 %v717_v4, %v717_v4  ;;  %v1502_v22 = vpack.c.bf16 %v779_v16, %v779_v16 }
 0x11c   : > { %v492_v30 = vpop.f32.mrb[0].mxu0 }
 0x11d   : > { %v508_v32 = vrot.slane %v492_v30, 4  ;;  %v494_v33 = vpop.f32.mrb[1].mxu0 }
 0x11e   : > { %v509_v34 = vrot.slane %v494_v33, 4  ;;  %v496_v35 = vpop.f32.mrb[2].mxu0 }
 0x11f   : > { %512 = vst [vmem:[#allocation2 + $0x8] sm:$0xf0] %v508_v32  ;;  %v497_v36 = vpop.f32.mrb[3].mxu0 }
 0x120   : > { %513 = vst [vmem:[#allocation2 + $0x10] sm:$0xf0] %v509_v34 }
 0x126   : > { %v1929_v43 = vld [vmem:[#allocation2 + $0x8] sm:$0xff] }
 0x127   : > { %v1931_v44 = vld [vmem:[#allocation2 + $0x10] sm:$0xff]  ;;  %v1488_v45 = vpack.c.bf16 %v1929_v43, %v1739_v2  ;;  %v529_v47 = vmul.f32 %v1929_v43, %v1923_v40  ;;  %v594_v56 = vmul.f32 %v1929_v43, %v1945_v49  ;;  %v631_v62 = vmul.f32 %v1929_v43, %v1967_v60 }
 0x128   : > { %v1940_v48 = vpack.c.bf16 %v1931_v44, %v1929_v43  ;;  %v1489_v50 = vpack.c.bf16 %v1931_v44, %v1931_v44  ;;  %v530_v51 = vmul.f32 %v1916_v37, %v1931_v44  ;;  %v595_v58 = vmul.f32 %v1925_v41, %v1931_v44 }
 0x129   : > { %568 = vrot.lane.b32.xlu0 %v1488_v45, %s1746_s21  ;;  %v1486_v54 = vpack.c.bf16 %v529_v47, %v528_v46  ;;  %v1490_v61 = vpack.c.bf16 %v594_v56, %v593_v55  ;;  %v632_v1 = vmul.f32 %v1952_v52, %v1931_v44  ;;  %v630_v2 = vmul.f32 0.0, %v1954_v53 }
 0x12a   : > { %665 = vst [vmem:[#allocation3 + $0x20] sm:$0xff] %v1940_v48  ;;  %570 = vrot.lane.b32.xlu1 %v1489_v50, %s1746_s21  ;;  %v1487_v57 = vpack.c.bf16 %v530_v51, %v530_v51  ;;  %v1491_v0 = vpack.c.bf16 %v595_v58, %v595_v58  ;;  %v678_v11 = vmul.f32 %v1978_v3, %v1929_v43 }
 0x12b   : > { %v1492_v5 = vpack.c.bf16 %v631_v62, %v630_v2  ;;  %v1493_v7 = vpack.c.bf16 %v632_v1, %v632_v1  ;;  %v679_v12 = vmul.f32 %v1988_v9, %v1931_v44  ;;  %v715_v18 = vmul.f32 %v1982_v6, %v1929_v43 }
 0x12c   : > { %v716_v19 = vmul.f32 %v2002_v15, %v1931_v44  ;;  %v777_v24 = vmul.f32 %v1997_v14, %v1929_v43  ;;  %v778_v25 = vmul.f32 %v2015_v20, %v1931_v44 }
 0x12d   : > { %542 = vrot.lane.b32.xlu0 %v1486_v54, %s1744_s24  ;;  %v1495_v17 = vpack.c.bf16 %v679_v12, %v678_v11 }
 0x12e   : > { %544 = vrot.lane.b32.xlu1 %v1487_v57, %s1744_s24  ;;  %v1497_v23 = vpack.c.bf16 %v716_v19, %v715_v18  ;;  %v1501_v26 = vpack.c.bf16 %v778_v25, %v777_v24 }
 0x12f   : > { %v695_v28 = vpop.permute.xlu1 %694 }
 0x131   : > { %607 = vrot.lane.b32.xlu0 %v1490_v61, %s1745_s27 }
 0x132   : > { %609 = vrot.lane.b32.xlu1 %v1491_v0, %s1745_s27 }
 0x135   : > { %644 = vrot.lane.b32.xlu0 %v1492_v5, %s1742_s22 }
 0x136   : > { %646 = vrot.lane.b32.xlu1 %v1493_v7, %s1742_s22 }
 0x139   : > { %754 = vrot.lane.b32.xlu0 %v1940_v48, %s1747_s29 }
 0x13a   : > { %731 = vrot.lane.b32.xlu1 %v1498_v10, %s1743_s25  ;;  %v697_v10 = vrot.slane %v695_v28, 4 }
 0x13d   : > { %692 = vrot.lane.b32.xlu0 %v1495_v17, %s1740_s14 }
 0x13e   : > { %756 = vrot.lane.b32.xlu1 %v1748_v21, %s1747_s29 }
 0x141   : > { %729 = vrot.lane.b32.xlu0 %v1497_v23, %s1743_s25 }
 0x142   : > { %793 = vrot.lane.b32.xlu1 %v1502_v22, %s1741_s16 }
 0x145   : > { %791 = vrot.lane.b32.xlu0 %v1501_v26, %s1741_s16 }
 0x19b   : > { %v569_v29 = vpop.permute.xlu0 %568 }
 0x19c   : > { %v572_v30 = vrot.slane %v569_v29, 4  ;;  %v571_v31 = vpop.permute.xlu1 %570 }
 0x19d   : > { %v573_v32 = vrot.slane %v571_v31, 4 }
 0x19f   : > { %v574_v33 = vsel %vm548_vm11, %v572_v30, %v573_v32  ;;  %v543_v34 = vpop.permute.xlu0 %542 }
 0x1a0   : > { %v576_v35 = vsel %vm575_vm12, %v569_v29, %v574_v33  ;;  %v546_v36 = vrot.slane %v543_v34, 4  ;;  %v545_v39 = vpop.permute.xlu1 %544 }
 0x1a1   : > { %578 = vst [vmem:[#allocation3 + $0x8] sm:$0xff] %v576_v35  ;;  %v547_v43 = vrot.slane %v545_v39, 4 }
 0x1a3   : > { %v549_v44 = vsel %vm548_vm11, %v546_v36, %v547_v43  ;;  %v608_v45 = vpop.permute.xlu0 %607 }
 0x1a4   : > { %v551_v46 = vsel %vm550_vm10, %v543_v34, %v549_v44  ;;  %v611_v47 = vrot.slane %v608_v45, 4  ;;  %v610_v50 = vpop.permute.xlu1 %609 }
 0x1a5   : > { %553 = vst [vmem:[#allocation3] sm:$0xff] %v551_v46  ;;  %v612_v51 = vrot.slane %v610_v50, 4  ;;  %v1444_v54 = vcombine.high %v551_v46, %v576_v35  ;;  %v1443_v55 = vcombine.low %v551_v46, %v576_v35  ;;  %v802_v46 = vld [vmem:[%s2172_s3] sm:$0x3] }
 0x1a7   : > { %v613_v56 = vsel %vm548_vm11, %v611_v47, %v612_v51  ;;  %v645_v57 = vpop.permute.xlu0 %644  ;;  %868 = vmatprep.subr.bf16.mxu1 %v1444_v54 }
 0x1a8   : > { %v615_v58 = vsel %vm614_vm9, %v608_v45, %v613_v56  ;;  %v648_v59 = vrot.slane %v645_v57, 4  ;;  %v647_v61 = vpop.permute.xlu1 %646  ;;  %869 = vmatpush1.bf16.msra.mxu1 %v1443_v55 }
 0x1a9   : > { %617 = vst [vmem:[#allocation3 + $0x10] sm:$0xff] %v615_v58  ;;  %v649_v62 = vrot.slane %v647_v61, 4 }
 0x1ab   : > { %v650_v0 = vsel %vm548_vm11, %v648_v59, %v649_v62  ;;  %v755_v1 = vpop.permute.xlu0 %754 }
 0x1ac   : > { %v652_v2 = vsel %vm651_vm8, %v645_v57, %v650_v0  ;;  %v732_v4 = vpop.permute.xlu1 %731  ;;  %v758_v16 = vrot.slane %v755_v1, 4 }
 0x1ad   : > { %654 = vst [vmem:[#allocation3 + $0x18] sm:$0xff] %v652_v2  ;;  %v1446_v5 = vcombine.high %v615_v58, %v652_v2  ;;  %v1445_v7 = vcombine.low %v615_v58, %v652_v2  ;;  %v734_v19 = vrot.slane %v732_v4, 4  ;;  %v930_v58 = vld [vmem:[%s2173_s4] sm:$0xf] }
 0x1af   : > { %v693_v8 = vpop.permute.xlu0 %692  ;;  %870 = vmatprep.subr.bf16.mxu1 %v1446_v5 }
 0x1b0   : > { %v696_v11 = vrot.slane %v693_v8, 4  ;;  %v757_v12 = vpop.permute.xlu1 %756  ;;  %871 = vmatpush1.bf16.msra.mxu1 %v1445_v7 }
 0x1b1   : > { %v759_v17 = vrot.slane %v757_v12, 4 }
 0x1b2   : > { %v698_v18 = vsel %vm548_vm11, %v696_v11, %v697_v10  ;;  %v938_v11 = vld [vmem:[%s2174_s5] sm:$0xf] }
 0x1b3   : > { %v700_v21 = vsel %vm625_vm7, %v693_v8, %v698_v18  ;;  %v760_v22 = vsel %vm548_vm11, %v758_v16, %v759_v17  ;;  %v730_v23 = vpop.permute.xlu0 %729  ;;  %v1072_v8 = vld [vmem:[#allocation2 + $0x18] sm:$0xf] }
 0x1b4   : > { %v762_v24 = vsel %vm761_vm13, %v755_v1, %v760_v22  ;;  %v733_v25 = vrot.slane %v730_v23, 4  ;;  %v794_v26 = vpop.permute.xlu1 %793  ;;  %v1448_v28 = vcombine.high %v1940_v48, %v700_v21  ;;  %v1447_v29 = vcombine.low %v1940_v48, %v700_v21  ;;  %v1101_v16 = vld [vmem:[#allocation2 + $0x18] sm:$0xf] }
 0x1b5   : > { %v796_v31 = vrot.slane %v794_v26, 4  ;;  %v1075_v10 = vmul.f32 %v1912_v27, %v1072_v8  ;;  %v1104_v18 = vmul.f32 %v1972_v63, %v1101_v16 }
 0x1b6   : > { %v735_v30 = vsel %vm548_vm11, %v733_v25, %v734_v19  ;;  %872 = vmatprep.subr.bf16.mxu1 %v1448_v28 }
 0x1b7   : > { %v737_v32 = vsel %vm588_vm6, %v730_v23, %v735_v30  ;;  %v792_v33 = vpop.permute.xlu0 %791  ;;  %873 = vmatpush1.bf16.msra.mxu1 %v1447_v29  ;;  %v1513_v12 = vpack.c.bf16 %v1075_v10, %v1075_v10  ;;  %v1515_v19 = vpack.c.bf16 %v1104_v18, %v1104_v18 }
 0x1b8   : > { %v795_v34 = vrot.slane %v792_v33, 4  ;;  %v1450_v35 = vcombine.high %v737_v32, %v762_v24  ;;  %v1449_v36 = vcombine.low %v737_v32, %v762_v24 }
 0x1b9   : > { %v1088_v17 = vrot.slane %v1513_v12, 6 }
 0x1ba   : > { %v797_v39 = vsel %vm548_vm11, %v795_v34, %v796_v31  ;;  %874 = vmatprep.subr.bf16.mxu1 %v1450_v35  ;;  %v950_v34 = vld [vmem:[#allocation2] sm:$0xf] }
 0x1bb   : > { %v799_v43 = vsel %vm523_vm5, %v792_v33, %v797_v39  ;;  %875 = vmatpush1.bf16.msra.mxu1 %v1449_v36 }
 0x1bc   : > { %v1452_v44 = vcombine.high %v799_v43, %v799_v43  ;;  %v1451_v45 = vcombine.low %v799_v43, %v799_v43 }
 0x1be   : > { %1453 = vmatprep.subr.msk.bf16.mxu1 %vm548_vm11, %v1452_v44  ;;  %v863_v48 = vsel %vm548_vm11, %v1451_v45, 0  ;;  %v953_v45 = vmul.f32 %v1918_v38, %v950_v34 }
 0x1bf   : > { %877 = vmatpush1.bf16.msra.mxu1 %v863_v48 }
 0x1c2   : > { %1454 = vmatmul.mubr.msk.bf16.vlgmr.msra.gmra.mrb[0].mxu1 %vm857_vm14, %v802_v46 }
 0x295   : > { %v902_v47 = vpop.f32.mrb[0].mxu1 }
 0x296   : > { %v909_v50 = vsel %vm548_vm11, %v902_v47, 0.0  ;;  %v904_v51 = vpop.f32.mrb[1].mxu1 }
 0x297   : > { %v910_v54 = vsel %vm548_vm11, %v904_v51, 0.0  ;;  %v906_v55 = vpop.f32.mrb[2].mxu1 }
 0x298   : > { %v907_v56 = vpop.f32.mrb[3].mxu1  ;;  %v911_v57 = vadd.f32 %v910_v54, %v909_v50 }
 0x29a   : > { %912 = vadd.xlane.f32.xlu0 %v911_v57 }
 0x2b0   : > { %933 = vperm.xlu0 %1613, %v930_v58  }
 0x327   : > { %v913_v59 = vpop.xlane.xlu0 %912 }
 0x328   : > { %v915_v61 = vmul.f32 0.00390625, %v913_v59 }
 0x32a   : > { %v916_v62 = vsub.f32 %v902_v47, %v915_v61  ;;  %v917_v0 = vsub.f32 %v904_v51, %v915_v61  ;;  %v1030_v51 = vld [vmem:[#allocation2] sm:$0xf] }
 0x32b   : > { %v977_v61 = vld [vmem:[#allocation2] sm:$0xf]  ;;  %v1033_v38 = vmul.f32 %v1954_v53, %v1030_v51 }
 0x32c   : > { %v918_v1 = vmul.f32 %v916_v62, %v916_v62  ;;  %v919_v2 = vmul.f32 %v917_v0, %v917_v0 }
 0x32e   : > { %v920_v4 = vsel %vm548_vm11, %v918_v1, 0.0  ;;  %v921_v5 = vsel %vm548_vm11, %v919_v2, 0.0 }
 0x32f   : > { %v922_v7 = vadd.f32 %v921_v5, %v920_v4  ;;  %v934_v24 = vpop.permute.xlu0 %933 }
 0x331   : > { %923 = vadd.xlane.f32.xlu1 %v922_v7 }
 0x342   : > { %941 = vperm.xlu1 %1614, %v938_v11  }
 0x346   : > { %1091 = vrot.lane.b32.xlu1 %v1088_v17, %s1740_s14 }
 0x34a   : > { %1118 = vrot.lane.b32.xlu1 %v1515_v19, %s1743_s25 }
 0x3be   : > { %v924_v21 = vpop.xlane.xlu1 %923 }
 0x3bf   : > { %v925_v22 = vmul.f32 0.00390625, %v924_v21 }
 0x3c1   : > { %v926_v23 = vadd.f32 1e-05, %v925_v22 }
 0x3c2   : > { %v942_v30 = vpop.permute.xlu1 %941 }
 0x3c3   : > { %1635 = vrsqrt.f32 %v926_v23 }
 0x3cd   : > { %v1636_v27 = vpop.eup %1635 }
 0x3ce   : > { %v928_v25 = vmul.f32 %v1636_v27, %v916_v62  ;;  %v929_v26 = vmul.f32 %v1636_v27, %v917_v0 }
 0x3d0   : > { %v936_v28 = vmul.f32 %v934_v24, %v928_v25  ;;  %v937_v29 = vmul.f32 %v934_v24, %v929_v26 }
 0x3d2   : > { %v944_v31 = vadd.f32 %v942_v30, %v936_v28  ;;  %v945_v32 = vadd.f32 %v942_v30, %v937_v29 }
 0x3d4   : > { %v946_v33 = vmax.f32 %v944_v31, 0.0  ;;  %v947_v63 = vmax.f32 %v945_v32, 0.0 }
 0x3d6   : > { %948 = vst [vmem:[#allocation2 + $0x8] sm:$0xf] %v946_v33  ;;  %949 = vst [vmem:[#allocation2 + $0x10] sm:$0xf] %v947_v63  ;;  %v1154_v33 = vld [vmem:[#allocation2 + $0x18] sm:$0xf] }
 0x3d7   : > { %v1157_v63 = vmul.f32 %v1995_v13, %v1154_v33 }
 0x3dd   : > { %v1099_v35 = vld [vmem:[#allocation2 + $0x8] sm:$0xf]  ;;  %v1100_v36 = vld [vmem:[#allocation2 + $0x10] sm:$0xf] }
 0x3de   : > { %v951_v39 = vld [vmem:[#allocation2 + $0x8] sm:$0xf]  ;;  %v1102_v43 = vmul.f32 %v1982_v6, %v1099_v35  ;;  %v1103_v44 = vmul.f32 %v1100_v36, %v2002_v15  ;;  %v1127_v47 = vld [vmem:[#allocation2 + $0x10] sm:$0xf] }
 0x3df   : > { %v954_v48 = vmul.f32 %v951_v39, %v1923_v40  ;;  %v1126_v46 = vld [vmem:[#allocation2 + $0x8] sm:$0xf]  ;;  %v952_v50 = vld [vmem:[#allocation2 + $0x10] sm:$0xf] }
 0x3e0   : > { %v1516_v54 = vpack.c.bf16 %v1127_v47, %v1126_v46  ;;  %v955_v55 = vmul.f32 %v1916_v37, %v952_v50  ;;  %v1031_v56 = vld [vmem:[#allocation2 + $0x8] sm:$0xf]  ;;  %v1514_v57 = vpack.c.bf16 %v1103_v44, %v1102_v43  ;;  %v1071_v15 = vld [vmem:[#allocation2 + $0x10] sm:$0xf] }
 0x3e1   : > { %v1503_v58 = vpack.c.bf16 %v954_v48, %v953_v45  ;;  %v1034_v59 = vmul.f32 %v1031_v56, %v1967_v60  ;;  %v978_v6 = vld [vmem:[#allocation2 + $0x8] sm:$0xf]  ;;  %v1060_v37 = vld [vmem:[#allocation2 + $0x10] sm:$0xf]  ;;  %v1074_v60 = vmul.f32 %v1071_v15, %v1988_v9  ;;  %v1003_v9 = vld [vmem:[#allocation2] sm:$0xf] }
 0x3e2   : > { %v1070_v62 = vld [vmem:[#allocation2 + $0x8] sm:$0xf]  ;;  %1116 = vrot.lane.b32.xlu0 %v1514_v57, %s1743_s25  ;;  %v1140_v40 = vrot.slane %v1516_v54, 6  ;;  %v1504_v0 = vpack.c.bf16 %v955_v55, %v955_v55  ;;  %v1505_v1 = vpack.c.bf16 %v978_v6, %v977_v61  ;;  %v979_v8 = vld [vmem:[#allocation2 + $0x10] sm:$0xf]  ;;  %v1006_v25 = vmul.f32 %v1927_v42, %v1003_v9 }
 0x3e3   : > { %967 = vrot.lane.b32.xlu1 %v1503_v58, %s1744_s24  ;;  %v1059_v2 = vld [vmem:[#allocation2 + $0x8] sm:$0xf]  ;;  %v1509_v4 = vpack.c.bf16 %v1034_v59, %v1033_v38  ;;  %v1073_v5 = vmul.f32 %v1978_v3, %v1070_v62  ;;  %v1506_v12 = vpack.c.bf16 %v979_v8, %v979_v8  ;;  %v1153_v17 = vld [vmem:[#allocation2 + $0x10] sm:$0xf] }
 0x3e4   : > { %v1511_v7 = vpack.c.bf16 %v1060_v37, %v1059_v2  ;;  %v991_v10 = vrot.slane %v1505_v1, 6  ;;  %v1152_v16 = vld [vmem:[#allocation2 + $0x8] sm:$0xf]  ;;  %v1156_v22 = vmul.f32 %v1153_v17, %v2015_v20  ;;  %v1005_v27 = vld [vmem:[#allocation2 + $0x10] sm:$0xf] }
 0x3e5   : > { %v1047_v53 = vrot.slane %v1509_v4, 6  ;;  %v1512_v11 = vpack.c.bf16 %v1074_v60, %v1073_v5  ;;  %v1004_v18 = vld [vmem:[#allocation2 + $0x8] sm:$0xf]  ;;  %v1155_v3 = vmul.f32 %v1997_v14, %v1152_v16  ;;  %v992_v21 = vrot.slane %v1506_v12, 6  ;;  %v1032_v24 = vld [vmem:[#allocation2 + $0x10] sm:$0xf] }
 0x3e6   : > { %1142 = vrot.lane.b32.xlu0 %v1140_v40, %s1747_s29  ;;  %1069 = vst [vmem:[#allocation3 + $0x10] sm:$0x33] %v1511_v7  ;;  %v1007_v23 = vmul.f32 %v1004_v18, %v1945_v49  ;;  %v1008_v29 = vmul.f32 %v1925_v41, %v1005_v27  ;;  %v1035_v14 = vmul.f32 %v1952_v52, %v1032_v24  ;;  %v1128_v20 = vld [vmem:[#allocation2 + $0x18] sm:$0xf]  ;;  %v1092_v52 = vpop.permute.xlu1 %1091 }
 0x3e7   : > { %969 = vrot.lane.b32.xlu1 %v1504_v0, %s1744_s24  ;;  %v1087_v19 = vrot.slane %v1512_v11, 6  ;;  %v1518_v26 = vpack.c.bf16 %v1156_v22, %v1155_v3  ;;  %v1517_v31 = vpack.c.bf16 %v1128_v20, %v1128_v20  ;;  %v1519_v41 = vpack.c.bf16 %v1157_v63, %v1157_v63  ;;  %s1671_s24 = sshll.u32 %s1749_s13, 4  ;;  %s1672_s24 = int_to_ptr.vmem [resolvable:$false] %s1671_s24 }
 0x3e8   : > { %v1507_v28 = vpack.c.bf16 %v1007_v23, %v1006_v25  ;;  %v1508_v49 = vpack.c.bf16 %v1008_v29, %v1008_v29  ;;  %v1510_v30 = vpack.c.bf16 %v1035_v14, %v1035_v14  ;;  %v1094_v58 = vrot.slane %v1092_v52, 4  ;;  %v1282_v52 = vld [vmem:[%s2176_s7] sm:$0xf] }
 0x3e9   : > { %v1141_v42 = vrot.slane %v1517_v31, 6 }
 0x3ea   : > { %1049 = vrot.lane.b32.xlu0 %v1047_v53, %s1742_s22  ;;  %v1048_v32 = vrot.slane %v1510_v30, 6  ;;  %v1119_v34 = vpop.permute.xlu1 %1118 }
 0x3eb   : > { %993 = vrot.lane.b32.xlu1 %v991_v10, %s1746_s21  ;;  %v1121_v39 = vrot.slane %v1119_v34, 4 }
 0x3ee   : > { %1089 = vrot.lane.b32.xlu0 %v1087_v19, %s1740_s14 }
 0x3ef   : > { %995 = vrot.lane.b32.xlu1 %v992_v21, %s1746_s21  ;;  %s351_s21 = sand.u32 1, %s1725_s10  }
 0x3f2   : > { %1169 = vrot.lane.b32.xlu0 %v1518_v26, %s1741_s16 }
 0x3f3   : > { %1020 = vrot.lane.b32.xlu1 %v1507_v28, %s1745_s27 }
 0x3f7   : > { %1022 = vrot.lane.b32.xlu1 %v1508_v49, %s1745_s27  ;;  %v1179_v49 = vld [vmem:[%s2175_s6] sm:$0x3]  ;;  %s1673_s27 = scalar_lea.vmem %s1672_s24, 256 }
 0x3fb   : > { %1051 = vrot.lane.b32.xlu1 %v1048_v32, %s1742_s22  ;;  %s1306_s22 = scalar_lea.sflag [#allocation6], %s351_s21 }
 0x3ff   : > { %1144 = vrot.lane.b32.xlu1 %v1141_v42, %s1747_s29  ;;  %s1409_s29 = sshll.u32 %s351_s21, 3 }
 0x400   : > { %s353_s23 = scalar_lea.vmem [#allocation7], %s1409_s29 }
 0x401   : > { %s1320_s17 = sshll.u32 %s353_s23, 4  ;;  %s2129_s17 = int_to_ptr.vmem [resolvable:$true] %s1320_s17 }
 0x402   : > { %s1667_s25 = scalar_lea.vmem %s2129_s17, 128  ;;  %p1674_p2 = scmp.lt.s32.totalorder %s2129_s17, %s1672_s24 }
 0x403   : > { %1171 = vrot.lane.b32.xlu1 %v1519_v41, %s1741_s16  ;;  %s2127_s16 = scalar_lea.hbm %s2178_s9, %s1520_s28  ;;  %p1668_p6 = scmp.ne.s32.totalorder %s2129_s17, %s1667_s25 }
 0x404   : > { %p1675_p3 = scmp.lt.s32.totalorder %s1673_s27, %s1667_s25 }
 0x405   : > { %p1669_p10 = pnand %p1668_p6, %p2189_p9 }
 0x406   : > { %p1676_p4 = por %p1675_p3, %p1674_p2 }
 0x407   : > { %p1670_p12 = pneg %p1669_p10 }
 0x409   : > { %p1677_p7 = pnand %p1676_p4, %p1670_p12 }
 0x454   : > { %v1117_v35 = vpop.permute.xlu0 %1116 }
 0x455   : > { %v968_v36 = vpop.permute.xlu1 %967  ;;  %v1120_v43 = vrot.slane %v1117_v35, 4 }
 0x456   : > { %v971_v47 = vrot.slane %v968_v36, 4 }
 0x457   : > { %v1122_v44 = vsel %vm548_vm11, %v1120_v43, %v1121_v39 }
 0x458   : > { %v1123_v45 = vsel %vm588_vm6, %v1117_v35, %v1122_v44  ;;  %v1143_v48 = vpop.permute.xlu0 %1142 }
 0x459   : > { %v970_v46 = vpop.permute.xlu1 %969  ;;  %1125 = vst [vmem:[#allocation3 + $0x18] sm:$0x33] %v1123_v45  ;;  %v1146_v12 = vrot.slane %v1143_v48, 4 }
 0x45a   : > { %v972_v13 = vrot.slane %v970_v46, 4 }
 0x45c   : > { %v973_v50 = vsel %vm548_vm11, %v971_v47, %v972_v13  ;;  %v1050_v54 = vpop.permute.xlu0 %1049  ;;  %v1290_v47 = vld [vmem:[%s2177_s8] sm:$0xf] }
 0x45d   : > { %v974_v51 = vsel %vm550_vm10, %v968_v36, %v973_v50  ;;  %v994_v55 = vpop.permute.xlu1 %993  ;;  %v1053_v7 = vrot.slane %v1050_v54, 4 }
 0x45e   : > { %976 = vst [vmem:[#allocation3] sm:$0x33] %v974_v51  ;;  %v997_v59 = vrot.slane %v994_v55, 4 }
 0x460   : > { %v1090_v56 = vpop.permute.xlu0 %1089 }
 0x461   : > { %v996_v57 = vpop.permute.xlu1 %995  ;;  %v1093_v61 = vrot.slane %v1090_v56, 4 }
 0x462   : > { %v998_v6 = vrot.slane %v996_v57, 4 }
 0x463   : > { %v1095_v62 = vsel %vm548_vm11, %v1093_v61, %v1094_v58 }
 0x464   : > { %v999_v15 = vsel %vm548_vm11, %v997_v59, %v998_v6  ;;  %v1096_v38 = vsel %vm625_vm7, %v1090_v56, %v1095_v62  ;;  %v1170_v17 = vpop.permute.xlu0 %1169 }
 0x465   : > { %v1000_v40 = vsel %vm575_vm12, %v994_v55, %v999_v15  ;;  %v1021_v0 = vpop.permute.xlu1 %1020  ;;  %1098 = vst [vmem:[#allocation3 + $0x10] sm:$0xcc] %v1096_v38  ;;  %v1173_v19 = vrot.slane %v1170_v17, 4 }
 0x466   : > { %1002 = vst [vmem:[#allocation3] sm:$0xcc] %v1000_v40  ;;  %v1024_v2 = vrot.slane %v1021_v0, 4 }
 0x469   : > { %v1023_v1 = vpop.permute.xlu1 %1022 }
 0x46a   : > { %v1025_v37 = vrot.slane %v1023_v1, 4 }
 0x46c   : > { %v1026_v4 = vsel %vm548_vm11, %v1024_v2, %v1025_v37 }
 0x46d   : > { %v1027_v5 = vsel %vm614_vm9, %v1021_v0, %v1026_v4  ;;  %v1052_v60 = vpop.permute.xlu1 %1051 }
 0x46e   : > { %1029 = vst [vmem:[#allocation3 + $0x8] sm:$0x33] %v1027_v5  ;;  %v1054_v8 = vrot.slane %v1052_v60, 4 }
 0x470   : > { %v1055_v53 = vsel %vm548_vm11, %v1053_v7, %v1054_v8 }
 0x471   : > { %v1056_v10 = vsel %vm651_vm8, %v1050_v54, %v1055_v53  ;;  %v1145_v11 = vpop.permute.xlu1 %1144 }
 0x472   : > { %1058 = vst [vmem:[#allocation3 + $0x8] sm:$0xcc] %v1056_v10  ;;  %v1147_v16 = vrot.slane %v1145_v11, 4 }
 0x474   : > { %v1148_v18 = vsel %vm548_vm11, %v1146_v12, %v1147_v16 }
 0x475   : > { %v1149_v3 = vsel %vm761_vm13, %v1143_v48, %v1148_v18  ;;  %v1172_v9 = vpop.permute.xlu1 %1171 }
 0x476   : > { %1151 = vst [vmem:[#allocation3 + $0x18] sm:$0xcc] %v1149_v3  ;;  %v1174_v21 = vrot.slane %v1172_v9, 4 }
 0x478   : > { %v1175_v22 = vsel %vm548_vm11, %v1173_v19, %v1174_v21 }
 0x479   : > { %v1176_v23 = vsel %vm523_vm5, %v1170_v17, %v1175_v22  ;;  %v1627_v27 = vld [vmem:[#allocation3] ss:$8 sps:$4 sm:$0xff]   ;;  %v1629_v24 = vld [vmem:[#allocation3 + $0x4] ss:$8 sps:$4 sm:$0xff]  }
 0x47a   : > { %1178 = vst [vmem:[#allocation3 + $0x20] sm:$0x33] %v1176_v23  ;;  %1221 = vmatprep.subr.bf16.mxu0 %v1629_v24 }
 0x47b   : > { %1222 = vmatpush1.bf16.msra.mxu0 %v1627_v27 }
 0x47d   : > { %v1630_v25 = vld [vmem:[#allocation3 + $0x10] ss:$8 sps:$4 sm:$0xff]   ;;  %v1632_v26 = vld [vmem:[#allocation3 + $0x14] ss:$8 sps:$4 sm:$0xff]  }
 0x47e   : > { %1223 = vmatprep.subr.bf16.mxu0 %v1632_v26 }
 0x47f   : > { %1224 = vmatpush1.bf16.msra.mxu0 %v1630_v25 }
 0x481   : > { %v1184_v28 = vld [vmem:[#allocation3 + $0x20] sm:$0x33] }
 0x482   : > { %v1477_v29 = vcombine.high %v1184_v28, %v1184_v28  ;;  %v1476_v14 = vcombine.low %v1184_v28, %v1184_v28 }
 0x484   : > { %1478 = vmatprep.subr.msk.bf16.mxu0 %vm1214_vm15, %v1477_v29  ;;  %v1216_v20 = vsel %vm1214_vm15, %v1476_v14, 0 }
 0x485   : > { %1226 = vmatpush1.bf16.msra.mxu0 %v1216_v20 }
 0x488   : > { %1479 = vmatmul.mubr.msk.bf16.vlgmr.msra.gmra.mrb[4].mxu0 %vm1210_vm0, %v1179_v49 }
 0x55b   : > { %v1255_v30 = vpop.f32.mrb[4].mxu0 }
 0x55c   : > { %v1262_v31 = vsel %vm548_vm11, %v1255_v30, 0.0  ;;  %v1257_v32 = vpop.f32.mrb[5].mxu0 }
 0x55d   : > { %v1263_v33 = vsel %vm548_vm11, %v1257_v32, 0.0  ;;  %v1259_v42 = vpop.f32.mrb[6].mxu0 }
 0x55e   : > { %v1260_v63 = vpop.f32.mrb[7].mxu0  ;;  %v1264_v41 = vadd.f32 %v1263_v33, %v1262_v31 }
 0x560   : > { %1265 = vadd.xlane.f32.xlu0 %v1264_v41 }
 0x576   : > { %1285 = vperm.xlu0 %1613, %v1282_v52  }
 0x5ed   : > { %v1266_v34 = vpop.xlane.xlu0 %1265 }
 0x5ee   : > { %v1267_v35 = vmul.f32 0.00390625, %v1266_v34 }
 0x5f0   : > { %v1268_v36 = vsub.f32 %v1255_v30, %v1267_v35  ;;  %v1269_v39 = vsub.f32 %v1257_v32, %v1267_v35 }
 0x5f2   : > { %v1270_v43 = vmul.f32 %v1268_v36, %v1268_v36  ;;  %v1271_v44 = vmul.f32 %v1269_v39, %v1269_v39 }
 0x5f4   : > { %v1272_v45 = vsel %vm548_vm11, %v1270_v43, 0.0  ;;  %v1273_v48 = vsel %vm548_vm11, %v1271_v44, 0.0 }
 0x5f5   : > { %v1274_v46 = vadd.f32 %v1273_v48, %v1272_v45  ;;  %v1286_v57 = vpop.permute.xlu0 %1285 }
 0x5f7   : > { %1275 = vadd.xlane.f32.xlu1 %v1274_v46 }
 0x608   : > { %1293 = vperm.xlu1 %1614, %v1290_v47  }
 0x684   : > { %v1276_v13 = vpop.xlane.xlu1 %1275 }
 0x685   : > { %v1277_v50 = vmul.f32 0.00390625, %v1276_v13 }
 0x687   : > { %v1278_v51 = vadd.f32 1e-05, %v1277_v50 }
 0x688   : > { %v1294_v61 = vpop.permute.xlu1 %1293 }
 0x689   : > { %1637 = vrsqrt.f32 %v1278_v51 }
 0x693   : > { %v1638_v54 = vpop.eup %1637 }
 0x694   : > { %v1280_v55 = vmul.f32 %v1638_v54, %v1268_v36  ;;  %v1281_v56 = vmul.f32 %v1638_v54, %v1269_v39 }
 0x696   : > { %v1288_v58 = vmul.f32 %v1286_v57, %v1280_v55  ;;  %v1289_v59 = vmul.f32 %v1286_v57, %v1281_v56 }
 0x698   : > { %v1296_v6 = vadd.f32 %v1294_v61, %v1288_v58  ;;  %v1297_v62 = vadd.f32 %v1294_v61, %v1289_v59 }
 0x69a   : > { %v1298_v15 = vmax.f32 %v1296_v6, 0.0  ;;  %v1299_v38 = vmax.f32 %v1297_v62, 0.0 }
 0x69c   : > { %v1302_v40 = vcombine.low %v1298_v15, %v1299_v38 }
 0x69e   : > { %1304 = vst [vmem:[%s353_s23] sm:$0xff] %v1302_v40 }
 0x69f   : > { %1680 = shalt.err (!%p1677_p7)
}
 0x6a0   : > { %s1681_s21 = scalar_lea.hbm %s2127_s16, 128  ;;  %s1685_s23 = scalar_lea.hbm %s2178_s9, 256 }
 0x6a1   : > { %p1682_p8 = scmp.ne.s32.totalorder %s2127_s16, %s1681_s21  ;;  %p1686_p1 = scmp.lt.u32.totalorder %s2127_s16, %s2178_s9 }
 0x6a2   : > { %p1687_p0 = scmp.lt.u32.totalorder %s1685_s23, %s1681_s21  ;;  %p1689_p6 = scmp.lt.u32.totalorder %s1681_s21, %s2127_s16 }
 0x6a3   : > { %p1683_p11 = pnand %p1682_p8, %p2189_p9 }
 0x6a4   : > { %p1688_p5 = por %p1687_p0, %p1686_p1 }
 0x6a5   : > { %p1684_p13 = pneg %p1683_p11 }
 0x6a6   : > { %p1690_p10 = por %p1689_p6, %p1688_p5 }
 0x6a8   : > { %p1691_p12 = pnand %p1690_p10, %p1684_p13 }
 0x6aa   : > { %1694 = shalt.err (!%p1691_p12)
}
 0x6ab   : > { %1525 = dma.vmem_to_hbm [thread:$0]  (%p2189_p9), %s2129_s17, 128, %s2127_s16, %s1306_s22  }
 0x6ac PF: > { %p1537_p2 = scmp.ge.s32.totalorder %s1733_s12, 2  ;;  %s1332_s25 = sand.u32 1, %s1721_s30  }
 0x6ad   : > { %p2190_p3 = scmp.ne.s32.totalorder %s2183_s20, 0  ;;  %s1333_s13 = scalar_lea.sflag [#allocation6], %s1332_s25 }
 0x6af   : > { %p1532_p4 = pnand %p1537_p2, %p2190_p3 }
 0x6b1   : > { %1716 = dma.done.wait (!%p1532_p4), %s1333_s13, 128  }
 0x6b2   : > { %1718 = vsyncadd (!%p1532_p4), %s1333_s13, 4294967168  ;;  %p20_p7 = scmp.ge.s32.totalorder %s1825_s15, 4   ;;  %s2191_s30 = smov %s1725_s10 }
 0x6b3   : > { %s2192_s10 = smov %s1729_s11  ;;  %s2193_s11 = smov %s1836_s18 }
 0x6b4   : > { %s2194_s12 = smov %s1825_s15  ;;  %22 = sbr.rel (!%p20_p7) target bundleno = 4 (0x4), region = 99 }
 0x6bb   :  { %1338 = vsyncpa [#allocation5], 1 }
 0x6bc   :  { %1340 = vsyncpa [#allocation5 + $0x1], 1 }
 0x6bd   :  { %1341 = vsyncpa [#allocation6], 1 }
 0x6be   :  { %1343 = vsyncpa [#allocation6 + $0x1], 1 }

</bundles_post_ra>
